<compile_context>
chip_gen: v5e
topology: v5e:2x2
jax: 0.10.0
libtpu: 0.0.40
codegen_flags: <defaults>
</compile_context>

<pallas_src>
import functools
import math

import jax
import jax.numpy as jnp
import numpy as np
from jax.experimental import pallas as pl
from jax.experimental.pallas import tpu as pltpu

LN_EPS = 1e-5


# --------------------------------------------------------------------------
# hardware / tiling helpers (all static, host-side Python)
# --------------------------------------------------------------------------
@functools.lru_cache(maxsize=1)
def _hw_config():
    """(vmem_limit_bytes, prefer_even_grid) derived from the local TPU."""
    vmem_phys = 128 * 1024 * 1024
    try:
        info = pltpu.get_tpu_info()
        vmem_phys = int(getattr(info, "vmem_capacity_bytes", vmem_phys))
    except Exception:
        pass
    kind = ""
    try:
        kind = jax.devices()[0].device_kind.lower()
    except Exception:
        pass
    small_vmem = vmem_phys <= 64 * 1024 * 1024
    # 2 TensorCores per chip: v7x-class (small VMEM) and v4/v5p megacore parts.
    two_cores = small_vmem or ("7" in kind) or ("v4" in kind) or ("v5p" in kind)
    if small_vmem:
        limit = min(44 * 1024 * 1024, (vmem_phys * 3) // 4)   # conservative on 64 MiB parts
    else:
        limit = 64 * 1024 * 1024                              # 128 MiB parts (v5e / v6e)
    return limit, two_cores


def _largest_divisor_leq(n, cap):
    cap = int(max(1, min(n, cap)))
    for d in range(cap, 0, -1):
        if n % d == 0:
            return d
    return 1


def _row_budget(c4, n, in_bytes, out_bytes, w_bytes, vmem_limit):
    """Rows per output block, from explicit VMEM accounting:
    double-buffered in/out blocks + resident weights + f32 LN temporaries."""
    resident = 2 * (c4 * n * w_bytes) + 8 * c4 * 4          # wa/wb (+buffering) + gamma/beta
    usable = int(vmem_limit * 0.70) - resident
    per_row = (2 * c4 * in_bytes            # input block, double buffered
               + 2 * n * out_bytes          # output block, double buffered
               + 16 * c4 + 4 * n)           # f32 LN / matmul temporaries
    return int(max(64, min(4096, usable // max(1, per_row))))


def _choose_tile(mh, target, prefer_even_grid):
    """Pick th (row-groups per block) and how many row-groups to pad."""
    target = int(max(1, min(mh, target)))
    th = _largest_divisor_leq(mh, target)
    if 2 * th < target:
        th = target                        # degenerate divisor: tile to target + pad
    if prefer_even_grid and mh > 1:
        steps = -(-mh // th)
        if steps % 2:
            steps += 1
            th = -(-mh // steps)           # even number of grid steps for 2 TCs
    pad = (-mh) % th
    return th, pad


def _const_spec(shape, single_buffer):
    """BlockSpec with a constant index map (block stays resident in VMEM).
    For large weights request single buffering to halve the VMEM footprint."""
    index_map = lambda i: (0,) * len(shape)
    if single_buffer and hasattr(pl, "Buffered"):
        try:
            return pl.BlockSpec(shape, index_map, pipeline_mode=pl.Buffered(1))
        except TypeError:
            pass
    return pl.BlockSpec(shape, index_map)


# --------------------------------------------------------------------------
# fused kernel: 2x2 gather + LayerNorm(4C) + (4C -> 2C) reduction
# --------------------------------------------------------------------------
def _fused_kernel(x_ref, ga_ref, gb_ref, ba_ref, bb_ref, wa_ref, wb_ref, o_ref):
    # x_ref:       (th, 2, W2, 2C) raw patch view (parity axis = H parity)
    # ga/gb/ba/bb: (1, 2C) permuted LayerNorm params
    # wa/wb:       (2C, N) permuted halves of the reduction weight
    # o_ref:       (th*W2, N)
    th, _, w2, k2 = x_ref.shape
    tm = th * w2
    inv_c4 = 1.0 / float(2 * k2)           # 1 / 4C

    x = x_ref[...]
    # Cast to f32 BEFORE the (th, W2, 2C) -> (th*W2, 2C) relabel; the wrapper
    # guarantees W2 % 8 == 0 so this reshape is a layout no-op for f32.
    xa = x[:, 0].astype(jnp.float32).reshape(tm, k2)    # [x0 | x2]
    xb = x[:, 1].astype(jnp.float32).reshape(tm, k2)    # [x1 | x3]

    # LayerNorm statistics over the virtual 4C axis (f32, centered form).
    s = jnp.sum(xa, axis=-1, keepdims=True) + jnp.sum(xb, axis=-1, keepdims=True)
    mean = s * inv_c4
    ca = xa - mean
    cb = xb - mean
    var = (jnp.sum(ca * ca, axis=-1, keepdims=True)
           + jnp.sum(cb * cb, axis=-1, keepdims=True)) * inv_c4
    inv = jax.lax.rsqrt(var + LN_EPS)

    ya = ca * inv * ga_ref[...].astype(jnp.float32) + ba_ref[...].astype(jnp.float32)
    yb = cb * inv * gb_ref[...].astype(jnp.float32) + bb_ref[...].astype(jnp.float32)

    # Matmul operands follow the weight dtype (bf16 -> bf16 MXU path); f32 acc.
    mm_dtype = wa_ref.dtype
    if k2 < 128:
        # Small C: one full-K matmul ((tm,4C) x (4C,N)) keeps the MXU K lanes busy.
        y = jnp.concatenate([ya, yb], axis=-1).astype(mm_dtype)
        w = jnp.concatenate([wa_ref[...], wb_ref[...]], axis=0)
        out = jnp.dot(y, w, preferred_element_type=jnp.float32)
    else:
        out = jnp.dot(ya.astype(mm_dtype), wa_ref[...],
                      preferred_element_type=jnp.float32)
        out = out + jnp.dot(yb.astype(mm_dtype), wb_ref[...],
                            preferred_element_type=jnp.float32)
    o_ref[...] = out.astype(o_ref.dtype)


def _fused_call(xv, ga, gb, ba, bb, wa, wb, th, out_dtype, vmem_limit, big_weights):
    mh, _, w2, k2 = xv.shape
    n = wa.shape[1]
    tm = th * w2
    m = mh * w2
    return pl.pallas_call(
        _fused_kernel,
        out_shape=jax.ShapeDtypeStruct((m, n), out_dtype),
        grid_spec=pltpu.PrefetchScalarGridSpec(
            num_scalar_prefetch=0,
            grid=(mh // th,),
            in_specs=[
                # one contiguous DMA per grid step (even+odd rows together)
                pl.BlockSpec((th, 2, w2, k2), lambda i: (i, 0, 0, 0)),
                _const_spec((1, k2), False),
                _const_spec((1, k2), False),
                _const_spec((1, k2), False),
                _const_spec((1, k2), False),
                _const_spec((k2, n), big_weights),
                _const_spec((k2, n), big_weights),
            ],
            out_specs=pl.BlockSpec((tm, n), lambda i: (i, 0)),
        ),
        compiler_params=pltpu.CompilerParams(
            dimension_semantics=("parallel",),
            vmem_limit_bytes=int(vmem_limit),
        ),
    )(xv, ga, gb, ba, bb, wa, wb)


# --------------------------------------------------------------------------
# parameter preparation (call once at module init, not per forward)
# --------------------------------------------------------------------------
def prepare_patch_merging_params(gamma, beta, w_red, *, weight_dtype=jnp.bfloat16):
    """Permute LayerNorm / Linear params once so the kernel's natural
    [x0|x2], [x1|x3] channel interleave matches torch's [x0,x1,x2,x3] concat
    order.  Weights are cast to bf16 for the MXU path (f32 accumulation)."""
    c4, n = w_red.shape
    assert c4 % 4 == 0
    c = c4 // 4
    g4 = gamma.reshape(4, c).astype(jnp.float32)
    b4 = beta.reshape(4, c).astype(jnp.float32)
    w4 = w_red.reshape(4, c, n).astype(weight_dtype)
    return {
        "ga": jnp.concatenate([g4[0], g4[2]]).reshape(1, 2 * c),
        "gb": jnp.concatenate([g4[1], g4[3]]).reshape(1, 2 * c),
        "ba": jnp.concatenate([b4[0], b4[2]]).reshape(1, 2 * c),
        "bb": jnp.concatenate([b4[1], b4[3]]).reshape(1, 2 * c),
        "wa": jnp.concatenate([w4[0], w4[2]], axis=0),   # (2C, N)
        "wb": jnp.concatenate([w4[1], w4[3]], axis=0),   # (2C, N)
    }


# --------------------------------------------------------------------------
# forward wrapper (mirrors PyTorch PatchMerging.forward) — fully jit-able
# --------------------------------------------------------------------------
def patch_merging_forward(x, params, *, H=None, W=None, input_H=256, input_W=128):
    """x: (B, L, C) -> (B, ceil(H/2)*ceil(W/2), 2C)."""
    B, L, C = x.shape
    if H is None or W is None:
        # Same float-math recovery as the PyTorch module; pass H/W to override.
        # TODO(synk): the float recovery can mis-infer H/W for some L/aspect
        # ratios (inherited from the original module) — callers should pass H/W.
        ratio = input_H / input_W
        base = math.sqrt(int(L / ratio))
        if H is None:
            H = int(base * ratio)
        if W is None:
            W = int(base)
    assert H * W == L, (H, W, L)
    N = params["wa"].shape[1]
    assert params["wa"].shape[0] == 2 * C, (params["wa"].shape, C)

    xr = x.reshape(B, H, W, C)
    pad_h = H % 2
    W2_out = (W + (W % 2)) // 2                   # what the torch module produces
    W2 = max(8, ((W2_out + 7) // 8) * 8)          # sublane-aligned fused layout
    pad_w = 2 * W2 - W                            # includes torch's W%2 zero column
    if pad_h or pad_w:
        xr = jnp.pad(xr, ((0, 0), (0, pad_h), (0, pad_w), (0, 0)))
    Hp = H + pad_h
    H2 = Hp // 2
    Mh = B * H2

    # Zero-copy relabel of the (padded) activation: (B,Hp,2*W2,C) -> (Mh,2,W2,2C).
    xv = xr.reshape(Mh, 2, W2, 2 * C)

    vmem_limit, prefer_even = _hw_config()
    in_b = jnp.dtype(x.dtype).itemsize
    w_b = jnp.dtype(params["wa"].dtype).itemsize
    rows = _row_budget(4 * C, N, in_b, in_b, w_b, vmem_limit)
    th, pad_mh = _choose_tile(Mh, max(1, rows // W2), prefer_even)
    if pad_mh:
        # cdiv-style tiling: pad a few row groups instead of tiny divisor tiles.
        xv = jnp.pad(xv, ((0, pad_mh), (0, 0), (0, 0), (0, 0)))

    big_weights = 2 * (2 * C) * N * w_b > (4 << 20)
    out2d = _fused_call(xv, params["ga"], params["gb"], params["ba"], params["bb"],
                        params["wa"], params["wb"], th, x.dtype, vmem_limit,
                        big_weights)

    out = out2d.reshape(Mh + pad_mh, W2, N)[:Mh, :W2_out]
    return out.reshape(B, H2 * W2_out, N)


# --------------------------------------------------------------------------
# pure-JAX reference (mirrors the PyTorch forward exactly)
# --------------------------------------------------------------------------
def _reference(x, gamma, beta, w_red, input_H=256, input_W=128):
    B, L, C = x.shape
    ratio = input_H / input_W
    base = math.sqrt(int(L / ratio))
    H, W = int(base * ratio), int(base)
    xr = x.reshape(B, H, W, C)
    xr = jnp.pad(xr, ((0, 0), (0, H % 2), (0, W % 2), (0, 0)))
    x0 = xr[:, 0::2, 0::2, :]
    x1 = xr[:, 1::2, 0::2, :]
    x2 = xr[:, 0::2, 1::2, :]
    x3 = xr[:, 1::2, 1::2, :]
    xc = jnp.concatenate([x0, x1, x2, x3], axis=-1).reshape(B, -1, 4 * C)
    mu = jnp.mean(xc, axis=-1, keepdims=True)
    var = jnp.mean((xc - mu) ** 2, axis=-1, keepdims=True)
    y = (xc - mu) * jax.lax.rsqrt(var + LN_EPS) * gamma + beta
    return jnp.einsum("blk,kn->bln", y, w_red,
                      precision=jax.lax.Precision.HIGHEST)


if __name__ == "__main__":
    key = jax.random.PRNGKey(0)
    kx, kg, kb, kw, kx2 = jax.random.split(key, 5)

    # Shared parameters (LayerNorm over 4C; Linear 4C -> 2C, no bias; w_red = W.T).
    C = 32
    gamma = 1.0 + 0.02 * jax.random.normal(kg, (4 * C,), dtype=jnp.float32)
    beta = 0.02 * jax.random.normal(kb, (4 * C,), dtype=jnp.float32)
    w_red = (1.0 / math.sqrt(4 * C)) * jax.random.normal(
        kw, (4 * C, 2 * C), dtype=jnp.float32)

    params = prepare_patch_merging_params(gamma, beta, w_red)
    fwd = jax.jit(patch_merging_forward,
                  static_argnames=("H", "W", "input_H", "input_W"))

    # Case 1: even H/W (H = 2*W) — aligned fused layout, no extra padding.
    B, H, W = 2, 32, 16
    x = jax.random.normal(kx, (B, H * W, C), dtype=jnp.float32)
    out = jax.block_until_ready(fwd(x, params, H=H, W=W))
    ref = jax.block_until_ready(_reference(x, gamma, beta, w_red))
    assert out.shape == (B, (H // 2) * (W // 2), 2 * C), out.shape
    np.testing.assert_allclose(np.asarray(out), np.asarray(ref),
                               atol=3e-2, rtol=3e-2)

    # Case 2: odd W — W2 is padded up to a sublane multiple inside the SAME
    # fused kernel (no slab fallback); extra output columns are sliced off.
    H_odd, W_odd = 14, 7
    x_odd = jax.random.normal(kx2, (B, H_odd * W_odd, C), dtype=jnp.float32)
    out_odd = jax.block_until_ready(fwd(x_odd, params, H=H_odd, W=W_odd))
    ref_odd = jax.block_until_ready(_reference(x_odd, gamma, beta, w_red))
    assert out_odd.shape == (B, (H_odd // 2) * ((W_odd + 1) // 2), 2 * C), out_odd.shape
    np.testing.assert_allclose(np.asarray(out_odd), np.asarray(ref_odd),
                               atol=3e-2, rtol=3e-2)

    print("KERNEL_OK")
</pallas_src>

<mosaic_0001>
module attributes {stable_mosaic.version = 11 : i64} {
  func.func @_fused_kernel(%arg0: i32, %arg1: memref<32x2x8x64xf32, #tpu.memory_space<vmem>>, %arg2: memref<1x64xf32, #tpu.memory_space<vmem>>, %arg3: memref<1x64xf32, #tpu.memory_space<vmem>>, %arg4: memref<1x64xf32, #tpu.memory_space<vmem>>, %arg5: memref<1x64xf32, #tpu.memory_space<vmem>>, %arg6: memref<64x64xbf16, #tpu.memory_space<vmem>>, %arg7: memref<64x64xbf16, #tpu.memory_space<vmem>>, %arg8: memref<256x64xf32, #tpu.memory_space<vmem>>) attributes {dimension_semantics = [#tpu.dimension_semantics<parallel>], iteration_bounds = array<i64: 1>, scalar_prefetch = 0 : i64, scratch_operands = 0 : i64, tpu.core_type = #tpu.core_type<tc>, window_params = [{transform_indices = @transform_0, window_bounds = array<i64: 32, 2, 8, 64>}, {pipeline_mode = #tpu.pipeline_mode<synchronous>, transform_indices = @transform_1, window_bounds = array<i64: 1, 64>}, {pipeline_mode = #tpu.pipeline_mode<synchronous>, transform_indices = @transform_2, window_bounds = array<i64: 1, 64>}, {pipeline_mode = #tpu.pipeline_mode<synchronous>, transform_indices = @transform_3, window_bounds = array<i64: 1, 64>}, {pipeline_mode = #tpu.pipeline_mode<synchronous>, transform_indices = @transform_4, window_bounds = array<i64: 1, 64>}, {pipeline_mode = #tpu.pipeline_mode<synchronous>, transform_indices = @transform_5, window_bounds = array<i64: 64, 64>}, {pipeline_mode = #tpu.pipeline_mode<synchronous>, transform_indices = @transform_6, window_bounds = array<i64: 64, 64>}, {transform_indices = @transform_7, window_bounds = array<i64: 256, 64>}]} {
    %c0 = arith.constant 0 : index
    %c0_0 = arith.constant 0 : index
    %c0_1 = arith.constant 0 : index
    %c0_2 = arith.constant 0 : index
    %0 = vector.load %arg1[%c0, %c0_0, %c0_1, %c0_2] : memref<32x2x8x64xf32, #tpu.memory_space<vmem>>, vector<32x2x8x64xf32>
    %1 = vector.extract_strided_slice %0 {offsets = [0, 0, 0, 0], sizes = [32, 1, 8, 64], strides = [1, 1, 1, 1]} : vector<32x2x8x64xf32> to vector<32x1x8x64xf32>
    %2 = vector.shape_cast %1 : vector<32x1x8x64xf32> to vector<32x8x64xf32>
    %3 = vector.shape_cast %2 : vector<32x8x64xf32> to vector<256x64xf32>
    %4 = vector.extract_strided_slice %0 {offsets = [0, 1, 0, 0], sizes = [32, 1, 8, 64], strides = [1, 1, 1, 1]} : vector<32x2x8x64xf32> to vector<32x1x8x64xf32>
    %5 = vector.shape_cast %4 : vector<32x1x8x64xf32> to vector<32x8x64xf32>
    %6 = vector.shape_cast %5 : vector<32x8x64xf32> to vector<256x64xf32>
    %cst = arith.constant dense<0.000000e+00> : vector<256xf32>
    %7 = vector.multi_reduction <add>, %3, %cst [1] : vector<256x64xf32> to vector<256xf32>
    %8 = vector.shape_cast %7 : vector<256xf32> to vector<256x1xf32>
    %cst_3 = arith.constant dense<0.000000e+00> : vector<256xf32>
    %9 = vector.multi_reduction <add>, %6, %cst_3 [1] : vector<256x64xf32> to vector<256xf32>
    %10 = vector.shape_cast %9 : vector<256xf32> to vector<256x1xf32>
    %11 = arith.addf %8, %10 : vector<256x1xf32>
    %cst_4 = arith.constant 7.812500e-03 : f32
    %12 = vector.broadcast %cst_4 : f32 to vector<256x1xf32>
    %13 = arith.mulf %11, %12 : vector<256x1xf32>
    %14 = vector.broadcast %13 : vector<256x1xf32> to vector<256x64xf32>
    %15 = arith.subf %3, %14 : vector<256x64xf32>
    %16 = vector.broadcast %13 : vector<256x1xf32> to vector<256x64xf32>
    %17 = arith.subf %6, %16 : vector<256x64xf32>
    %18 = arith.mulf %15, %15 : vector<256x64xf32>
    %cst_5 = arith.constant dense<0.000000e+00> : vector<256xf32>
    %19 = vector.multi_reduction <add>, %18, %cst_5 [1] : vector<256x64xf32> to vector<256xf32>
    %20 = vector.shape_cast %19 : vector<256xf32> to vector<256x1xf32>
    %21 = arith.mulf %17, %17 : vector<256x64xf32>
    %cst_6 = arith.constant dense<0.000000e+00> : vector<256xf32>
    %22 = vector.multi_reduction <add>, %21, %cst_6 [1] : vector<256x64xf32> to vector<256xf32>
    %23 = vector.shape_cast %22 : vector<256xf32> to vector<256x1xf32>
    %24 = arith.addf %20, %23 : vector<256x1xf32>
    %cst_7 = arith.constant 7.812500e-03 : f32
    %25 = vector.broadcast %cst_7 : f32 to vector<256x1xf32>
    %26 = arith.mulf %24, %25 : vector<256x1xf32>
    %cst_8 = arith.constant 9.99999974E-6 : f32
    %27 = vector.broadcast %cst_8 : f32 to vector<256x1xf32>
    %28 = arith.addf %26, %27 : vector<256x1xf32>
    %29 = math.rsqrt %28 : vector<256x1xf32>
    %30 = vector.broadcast %29 : vector<256x1xf32> to vector<256x64xf32>
    %31 = arith.mulf %15, %30 : vector<256x64xf32>
    %c0_9 = arith.constant 0 : index
    %c0_10 = arith.constant 0 : index
    %32 = vector.load %arg2[%c0_9, %c0_10] : memref<1x64xf32, #tpu.memory_space<vmem>>, vector<1x64xf32>
    %33 = vector.broadcast %32 : vector<1x64xf32> to vector<256x64xf32>
    %34 = arith.mulf %31, %33 : vector<256x64xf32>
    %c0_11 = arith.constant 0 : index
    %c0_12 = arith.constant 0 : index
    %35 = vector.load %arg4[%c0_11, %c0_12] : memref<1x64xf32, #tpu.memory_space<vmem>>, vector<1x64xf32>
    %36 = vector.broadcast %35 : vector<1x64xf32> to vector<256x64xf32>
    %37 = arith.addf %34, %36 : vector<256x64xf32>
    %38 = vector.broadcast %29 : vector<256x1xf32> to vector<256x64xf32>
    %39 = arith.mulf %17, %38 : vector<256x64xf32>
    %c0_13 = arith.constant 0 : index
    %c0_14 = arith.constant 0 : index
    %40 = vector.load %arg3[%c0_13, %c0_14] : memref<1x64xf32, #tpu.memory_space<vmem>>, vector<1x64xf32>
    %41 = vector.broadcast %40 : vector<1x64xf32> to vector<256x64xf32>
    %42 = arith.mulf %39, %41 : vector<256x64xf32>
    %c0_15 = arith.constant 0 : index
    %c0_16 = arith.constant 0 : index
    %43 = vector.load %arg5[%c0_15, %c0_16] : memref<1x64xf32, #tpu.memory_space<vmem>>, vector<1x64xf32>
    %44 = vector.broadcast %43 : vector<1x64xf32> to vector<256x64xf32>
    %45 = arith.addf %42, %44 : vector<256x64xf32>
    %46 = tpu.concatenate %37, %45 in 1 : vector<256x64xf32>, vector<256x64xf32> -> vector<256x128xf32>
    %47 = arith.truncf %46 : vector<256x128xf32> to vector<256x128xbf16>
    %c0_17 = arith.constant 0 : index
    %c0_18 = arith.constant 0 : index
    %48 = vector.load %arg6[%c0_17, %c0_18] : memref<64x64xbf16, #tpu.memory_space<vmem>>, vector<64x64xbf16>
    %c0_19 = arith.constant 0 : index
    %c0_20 = arith.constant 0 : index
    %49 = vector.load %arg7[%c0_19, %c0_20] : memref<64x64xbf16, #tpu.memory_space<vmem>>, vector<64x64xbf16>
    %50 = tpu.concatenate %48, %49 in 0 : vector<64x64xbf16>, vector<64x64xbf16> -> vector<128x64xbf16>
    %cst_21 = arith.constant dense<0.000000e+00> : vector<256x64xf32>
    %51 = tpu.matmul %47, %50, %cst_21 {dimension_numbers = #tpu.dot_dimension_numbers<[1], [0], [0], [1], [0, 0, 1, 1], [], []>} : vector<256x128xbf16>, vector<128x64xbf16>, vector<256x64xf32> -> vector<256x64xf32>
    %c0_22 = arith.constant 0 : index
    %c0_23 = arith.constant 0 : index
    %52 = vector.load %arg8[%c0_22, %c0_23] : memref<256x64xf32, #tpu.memory_space<vmem>>, vector<256x64xf32>
    tpu.vector_store %arg8[%c0_22, %c0_23], %51 {strides = array<i32>} : memref<256x64xf32, #tpu.memory_space<vmem>>, vector<256x64xf32>,
    return
  }
  func.func @transform_0(%arg0: i32) -> (i32, i32, i32, i32) {
    %c0_i32 = arith.constant 0 : i32
    %c0_i32_0 = arith.constant 0 : i32
    %c0_i32_1 = arith.constant 0 : i32
    %c0_i32_2 = arith.constant 0 : i32
    return %arg0, %c0_i32, %c0_i32_0, %c0_i32_1 : i32, i32, i32, i32
  }
  func.func @transform_1(%arg0: i32) -> (i32, i32) {
    %c0_i32 = arith.constant 0 : i32
    %c0_i32_0 = arith.constant 0 : i32
    %c0_i32_1 = arith.constant 0 : i32
    return %c0_i32, %c0_i32_0 : i32, i32
  }
  func.func @transform_2(%arg0: i32) -> (i32, i32) {
    %c0_i32 = arith.constant 0 : i32
    %c0_i32_0 = arith.constant 0 : i32
    %c0_i32_1 = arith.constant 0 : i32
    return %c0_i32, %c0_i32_0 : i32, i32
  }
  func.func @transform_3(%arg0: i32) -> (i32, i32) {
    %c0_i32 = arith.constant 0 : i32
    %c0_i32_0 = arith.constant 0 : i32
    %c0_i32_1 = arith.constant 0 : i32
    return %c0_i32, %c0_i32_0 : i32, i32
  }
  func.func @transform_4(%arg0: i32) -> (i32, i32) {
    %c0_i32 = arith.constant 0 : i32
    %c0_i32_0 = arith.constant 0 : i32
    %c0_i32_1 = arith.constant 0 : i32
    return %c0_i32, %c0_i32_0 : i32, i32
  }
  func.func @transform_5(%arg0: i32) -> (i32, i32) {
    %c0_i32 = arith.constant 0 : i32
    %c0_i32_0 = arith.constant 0 : i32
    %c0_i32_1 = arith.constant 0 : i32
    return %c0_i32, %c0_i32_0 : i32, i32
  }
  func.func @transform_6(%arg0: i32) -> (i32, i32) {
    %c0_i32 = arith.constant 0 : i32
    %c0_i32_0 = arith.constant 0 : i32
    %c0_i32_1 = arith.constant 0 : i32
    return %c0_i32, %c0_i32_0 : i32, i32
  }
  func.func @transform_7(%arg0: i32) -> (i32, i32) {
    %c0_i32 = arith.constant 0 : i32
    %c0_i32_0 = arith.constant 0 : i32
    return %arg0, %c0_i32 : i32, i32
  }
}

</mosaic_0001>

<bundles_post_ra>
// kernel: patch_merging_forward.1
= control target key start
LH: loop header
LB: loop body
LE: loop exit
PB: predicated region body
PF: predicated region fallthrough
CT: control target
= control target key end

     0   :  { %vm90_vm0 = vcmask 523264   ;;  %s1875_s25 = smov 64   ;;  %s3755_s0 = inlined_call_operand.vmem [shape: f32[32,2,8,64], index: 0, kind: input, shape index: {}]   ;;  %s3756_s2 = inlined_call_operand.vmem [shape: f32[1,64], index: 2, kind: input, shape index: {}]   ;;  %s3757_s4 = inlined_call_operand.vmem [shape: f32[1,64], index: 4, kind: input, shape index: {}]   ;;  %s3758_s1 = inlined_call_operand.vmem [shape: f32[1,64], index: 1, kind: input, shape index: {}]   ;;  %s3759_s3 = inlined_call_operand.vmem [shape: f32[1,64], index: 3, kind: input, shape index: {}]   ;;  %s3760_s6 = inlined_call_operand.vmem [shape: bf16[64,64], index: 6, kind: input, shape index: {}]   ;;  %s3761_s5 = inlined_call_operand.vmem [shape: bf16[64,64], index: 5, kind: input, shape index: {}]   ;;  %s3762_s7 = inlined_call_operand.vmem [shape: f32[256,64], index: 7, kind: output, shape index: {}]  }
   0x1   :  { %v1919_v0 = vld [vmem:[%s3755_s0 + $0x40] sm:$0xff]  ;;  %v1940_v6 = vld [vmem:[%s3755_s0 + $0x50] sm:$0xff]  ;;  %v2122_v61 = vld [vmem:[%s3755_s0 + $0x8] sm:$0xff] }
   0x2   :  { %3833 = vst [vmem:[#allocation2_spill] sm:$0xff] %v1919_v0  ;;  %v1924_v1 = vld [vmem:[%s3755_s0 + $0x20] sm:$0xff]  ;;  %v103_v3 = vsel %vm90_vm0, %v1919_v0, 0.0  ;;  %v1945_v7 = vld [vmem:[%s3755_s0 + $0x30] sm:$0xff]  ;;  %v106_v9 = vsel %vm90_vm0, %v1940_v6, 0.0 }
   0x3   :  { %v1929_v2 = vld [vmem:[%s3755_s0] sm:$0xff]  ;;  %v97_v4 = vsel %vm90_vm0, %v1924_v1, 0.0  ;;  %104 = vadd.xlane.f32.xlu2 %v103_v3  ;;  %3834 = vst [vmem:[#allocation3_spill] sm:$0xff] %v1940_v6  ;;  %v1950_v8 = vld [vmem:[%s3755_s0 + $0x10] sm:$0xff]  ;;  %v100_v10 = vsel %vm90_vm0, %v1945_v7, 0.0  ;;  %v187_v3 = vsel %vm90_vm0, %v2122_v61, 0.0 }
   0x4   :  { %v91_v5 = vsel %vm90_vm0, %v1929_v2, 0.0  ;;  %98 = vadd.xlane.f32.xlu1 %v97_v4  ;;  %v94_v11 = vsel %vm90_vm0, %v1950_v8, 0.0  ;;  %v1961_v12 = vld [vmem:[%s3755_s0 + $0x80] sm:$0xff]  ;;  %v40_v13 = vld [vmem:[%s3755_s0 + $0x70] sm:$0xff] }
   0x5   :  { %92 = vadd.xlane.f32.xlu0 %v91_v5  ;;  %v38_v14 = vld [vmem:[%s3755_s0 + $0x60] sm:$0xff]  ;;  %v115_v15 = vsel %vm90_vm0, %v1961_v12, 0.0  ;;  %v112_v16 = vsel %vm90_vm0, %v40_v13, 0.0  ;;  %v1976_v18 = vld [vmem:[%s3755_s0 + $0xb0] sm:$0xff]  ;;  %v2138_v5 = vld [vmem:[%s3755_s0 + $0x28] sm:$0xff] }
   0x6   :  { %v109_v17 = vsel %vm90_vm0, %v38_v14, 0.0  ;;  %3835 = vst [vmem:[#allocation4_spill] sm:$0xff] %v1976_v18  ;;  %v1981_v19 = vld [vmem:[%s3755_s0 + $0xa0] sm:$0xff]  ;;  %v1986_v20 = vld [vmem:[%s3755_s0 + $0x90] sm:$0xff]  ;;  %v124_v21 = vsel %vm90_vm0, %v1976_v18, 0.0 }
   0x7   :  { %v121_v22 = vsel %vm90_vm0, %v1981_v19, 0.0  ;;  %v118_v23 = vsel %vm90_vm0, %v1986_v20, 0.0  ;;  %v54_v24 = vld [vmem:[%s3755_s0 + $0xe0] sm:$0xff]  ;;  %v2000_v25 = vld [vmem:[%s3755_s0 + $0xd0] sm:$0xff]  ;;  %3846 = vst [vmem:[#allocation15_spill] sm:$0xff] %v2138_v5 }
   0x8   :  { %3836 = vst [vmem:[#allocation5_spill] sm:$0xff] %v2000_v25  ;;  %v2005_v26 = vld [vmem:[%s3755_s0 + $0xc0] sm:$0xff]  ;;  %v133_v27 = vsel %vm90_vm0, %v54_v24, 0.0  ;;  %v130_v28 = vsel %vm90_vm0, %v2000_v25, 0.0  ;;  %v2015_v30 = vld [vmem:[%s3755_s0 + $0x110] sm:$0xff]  ;;  %v2180_v24 = vld [vmem:[%s3755_s0 + $0x88] sm:$0xff] }
   0x9   :  { %3837 = vst [vmem:[#allocation6_spill] sm:$0xff] %v2005_v26  ;;  %v127_v29 = vsel %vm90_vm0, %v2005_v26, 0.0  ;;  %v2020_v31 = vld [vmem:[%s3755_s0 + $0x100] sm:$0xff]  ;;  %v56_v32 = vld [vmem:[%s3755_s0 + $0xf0] sm:$0xff]  ;;  %v142_v33 = vsel %vm90_vm0, %v2015_v30, 0.0  ;;  %v2367_v26 = vld [vmem:[%s3755_s0 + $0x168] sm:$0xff] }
   0xa   :  { %v139_v34 = vsel %vm90_vm0, %v2020_v31, 0.0  ;;  %v136_v35 = vsel %vm90_vm0, %v56_v32, 0.0  ;;  %v2033_v36 = vld [vmem:[%s3755_s0 + $0x140] sm:$0xff]  ;;  %v2038_v37 = vld [vmem:[%s3755_s0 + $0x130] sm:$0xff]  ;;  %3871 = vst [vmem:[#allocation40_spill] sm:$0xff] %v2367_v26  ;;  %v253_v25 = vsel %vm90_vm0, %v2367_v26, 0.0 }
   0xb   :  { %107 = vadd.xlane.f32.xlu2 %v106_v9  ;;  %3838 = vst [vmem:[#allocation7_spill] sm:$0xff] %v2033_v36  ;;  %v2043_v38 = vld [vmem:[%s3755_s0 + $0x120] sm:$0xff]  ;;  %v151_v39 = vsel %vm90_vm0, %v2033_v36, 0.0  ;;  %v148_v40 = vsel %vm90_vm0, %v2038_v37, 0.0  ;;  %v2054_v42 = vld [vmem:[%s3755_s0 + $0x170] sm:$0xff]  ;;  %v2143_v9 = vld [vmem:[%s3755_s0 + $0x38] sm:$0xff] }
   0xc   :  { %101 = vadd.xlane.f32.xlu1 %v100_v10  ;;  %v145_v41 = vsel %vm90_vm0, %v2043_v38, 0.0  ;;  %3839 = vst [vmem:[#allocation8_spill] sm:$0xff] %v2054_v42  ;;  %v2059_v43 = vld [vmem:[%s3755_s0 + $0x160] sm:$0xff]  ;;  %v2064_v44 = vld [vmem:[%s3755_s0 + $0x150] sm:$0xff]  ;;  %v160_v45 = vsel %vm90_vm0, %v2054_v42, 0.0  ;;  %v2148_v10 = vld [vmem:[%s3755_s0 + $0x18] sm:$0xff] }
   0xd   :  { %95 = vadd.xlane.f32.xlu0 %v94_v11  ;;  %3840 = vst [vmem:[#allocation9_spill] sm:$0xff] %v2059_v43  ;;  %v157_v46 = vsel %vm90_vm0, %v2059_v43, 0.0  ;;  %v154_v47 = vsel %vm90_vm0, %v2064_v44, 0.0  ;;  %v2075_v48 = vld [vmem:[%s3755_s0 + $0x1a0] sm:$0xff]  ;;  %v2080_v49 = vld [vmem:[%s3755_s0 + $0x190] sm:$0xff]  ;;  %v193_v11 = vsel %vm90_vm0, %v2138_v5, 0.0 }
   0xe   :  { %3841 = vst [vmem:[#allocation10_spill] sm:$0xff] %v2064_v44  ;;  %v2085_v50 = vld [vmem:[%s3755_s0 + $0x180] sm:$0xff]  ;;  %v169_v51 = vsel %vm90_vm0, %v2075_v48, 0.0  ;;  %v166_v52 = vsel %vm90_vm0, %v2080_v49, 0.0  ;;  %v2096_v54 = vld [vmem:[%s3755_s0 + $0x1d0] sm:$0xff]  ;;  %v196_v13 = vsel %vm90_vm0, %v2143_v9, 0.0 }
   0xf   :  { %v163_v53 = vsel %vm90_vm0, %v2085_v50, 0.0  ;;  %3842 = vst [vmem:[#allocation11_spill] sm:$0xff] %v2096_v54  ;;  %v2101_v55 = vld [vmem:[%s3755_s0 + $0x1c0] sm:$0xff]  ;;  %v2106_v56 = vld [vmem:[%s3755_s0 + $0x1b0] sm:$0xff]  ;;  %v178_v57 = vsel %vm90_vm0, %v2096_v54, 0.0  ;;  %v190_v14 = vsel %vm90_vm0, %v2148_v10, 0.0 }
  0x10   :  { %3843 = vst [vmem:[#allocation12_spill] sm:$0xff] %v2101_v55  ;;  %v175_v58 = vsel %vm90_vm0, %v2101_v55, 0.0  ;;  %v172_v59 = vsel %vm90_vm0, %v2106_v56, 0.0  ;;  %v2117_v60 = vld [vmem:[%s3755_s0 + $0x1f0] sm:$0xff]  ;;  %v2127_v62 = vld [vmem:[%s3755_s0 + $0x1e0] sm:$0xff] }
  0x11   :  { %3844 = vst [vmem:[#allocation13_spill] sm:$0xff] %v2117_v60  ;;  %v184_v63 = vsel %vm90_vm0, %v2117_v60, 0.0  ;;  %v181_v4 = vsel %vm90_vm0, %v2127_v62, 0.0  ;;  %v2330_v60 = vld [vmem:[%s3755_s0 + $0x1c8] sm:$0xff] }
  0x12   :  { %3845 = vst [vmem:[#allocation14_spill] sm:$0xff] %v2127_v62 }
  0x13   :  { %116 = vadd.xlane.f32.xlu2 %v115_v15  ;;  %3847 = vst [vmem:[#allocation16_spill] sm:$0xff] %v2143_v9  ;;  %v2159_v15 = vld [vmem:[%s3755_s0 + $0x58] sm:$0xff] }
  0x14   :  { %113 = vadd.xlane.f32.xlu1 %v112_v16  ;;  %3848 = vst [vmem:[#allocation17_spill] sm:$0xff] %v2159_v15  ;;  %v2164_v16 = vld [vmem:[%s3755_s0 + $0x68] sm:$0xff] }
  0x15   :  { %110 = vadd.xlane.f32.xlu0 %v109_v17  ;;  %3849 = vst [vmem:[#allocation18_spill] sm:$0xff] %v2164_v16  ;;  %v2169_v17 = vld [vmem:[%s3755_s0 + $0x48] sm:$0xff] }
  0x16   :  { %3850 = vst [vmem:[#allocation19_spill] sm:$0xff] %v2169_v17 }
  0x17   :  { %3863 = vst [vmem:[#allocation32_spill] sm:$0xff] %v2330_v60 }
  0x1b   :  { %125 = vadd.xlane.f32.xlu2 %v124_v21  ;;  %v202_v21 = vsel %vm90_vm0, %v2159_v15, 0.0  ;;  %v2362_v15 = vld [vmem:[%s3755_s0 + $0x1e8] sm:$0xff] }
  0x1c   :  { %122 = vadd.xlane.f32.xlu1 %v121_v22  ;;  %v205_v22 = vsel %vm90_vm0, %v2164_v16, 0.0  ;;  %3870 = vst [vmem:[#allocation39_spill] sm:$0xff] %v2362_v15 }
  0x1d   :  { %119 = vadd.xlane.f32.xlu0 %v118_v23  ;;  %v199_v23 = vsel %vm90_vm0, %v2169_v17, 0.0 }
  0x23   :  { %134 = vadd.xlane.f32.xlu2 %v133_v27  ;;  %v2185_v27 = vld [vmem:[%s3755_s0 + $0x98] sm:$0xff] }
  0x24   :  { %131 = vadd.xlane.f32.xlu1 %v130_v28  ;;  %v2190_v28 = vld [vmem:[%s3755_s0 + $0x78] sm:$0xff]  ;;  %v214_v32 = vsel %vm90_vm0, %v2185_v27, 0.0 }
  0x25   :  { %128 = vadd.xlane.f32.xlu0 %v127_v29  ;;  %3851 = vst [vmem:[#allocation20_spill] sm:$0xff] %v2190_v28  ;;  %v211_v29 = vsel %vm90_vm0, %v2180_v24, 0.0 }
  0x2b   :  { %143 = vadd.xlane.f32.xlu2 %v142_v33  ;;  %v208_v33 = vsel %vm90_vm0, %v2190_v28, 0.0 }
  0x2c   :  { %140 = vadd.xlane.f32.xlu1 %v139_v34  ;;  %v2201_v34 = vld [vmem:[%s3755_s0 + $0xb8] sm:$0xff] }
  0x2d   :  { %137 = vadd.xlane.f32.xlu0 %v136_v35  ;;  %3852 = vst [vmem:[#allocation21_spill] sm:$0xff] %v2201_v34  ;;  %v2206_v35 = vld [vmem:[%s3755_s0 + $0xc8] sm:$0xff] }
  0x2e   :  { %3853 = vst [vmem:[#allocation22_spill] sm:$0xff] %v2206_v35 }
  0x33   :  { %152 = vadd.xlane.f32.xlu2 %v151_v39  ;;  %v2211_v39 = vld [vmem:[%s3755_s0 + $0xa8] sm:$0xff] }
  0x34   :  { %149 = vadd.xlane.f32.xlu1 %v148_v40  ;;  %3854 = vst [vmem:[#allocation23_spill] sm:$0xff] %v2211_v39  ;;  %v220_v40 = vsel %vm90_vm0, %v2201_v34, 0.0 }
  0x35   :  { %146 = vadd.xlane.f32.xlu0 %v145_v41  ;;  %v223_v41 = vsel %vm90_vm0, %v2206_v35, 0.0 }
  0x3b   :  { %161 = vadd.xlane.f32.xlu2 %v160_v45  ;;  %v217_v45 = vsel %vm90_vm0, %v2211_v39, 0.0 }
  0x3c   :  { %158 = vadd.xlane.f32.xlu1 %v157_v46  ;;  %v2222_v46 = vld [vmem:[%s3755_s0 + $0x118] sm:$0xff] }
  0x3d   :  { %155 = vadd.xlane.f32.xlu0 %v154_v47  ;;  %v2227_v47 = vld [vmem:[%s3755_s0 + $0x188] sm:$0xff] }
  0x43   :  { %170 = vadd.xlane.f32.xlu2 %v169_v51 }
  0x44   :  { %167 = vadd.xlane.f32.xlu1 %v166_v52 }
  0x45   :  { %164 = vadd.xlane.f32.xlu0 %v163_v53  ;;  %v2236_v53 = vld [vmem:[%s3755_s0 + $0x108] sm:$0xff] }
  0x4b   :  { %179 = vadd.xlane.f32.xlu2 %v178_v57 }
  0x4c   :  { %176 = vadd.xlane.f32.xlu1 %v175_v58  ;;  %v238_v58 = vsel %vm90_vm0, %v2222_v46, 0.0 }
  0x4d   :  { %173 = vadd.xlane.f32.xlu0 %v172_v59  ;;  %v259_v59 = vsel %vm90_vm0, %v2227_v47, 0.0 }
  0x53   :  { %188 = vadd.xlane.f32.xlu2 %v187_v3  ;;  %v2249_v3 = vld [vmem:[%s3755_s0 + $0xd8] sm:$0xff] }
  0x54   :  { %185 = vadd.xlane.f32.xlu1 %v184_v63  ;;  %v235_v63 = vsel %vm90_vm0, %v2236_v53, 0.0  ;;  %3856 = vst [vmem:[#allocation25_spill] sm:$0xff] %v2249_v3 }
  0x55   :  { %182 = vadd.xlane.f32.xlu0 %v181_v4  ;;  %v2254_v4 = vld [vmem:[%s3755_s0 + $0xe8] sm:$0xff] }
  0x56   :  { %3857 = vst [vmem:[#allocation26_spill] sm:$0xff] %v2254_v4 }
  0x5b   :  { %197 = vadd.xlane.f32.xlu2 %v196_v13 }
  0x5c   :  { %194 = vadd.xlane.f32.xlu1 %v193_v11 }
  0x5d   :  { %191 = vadd.xlane.f32.xlu0 %v190_v14  ;;  %v2263_v14 = vld [vmem:[%s3755_s0 + $0x198] sm:$0xff] }
  0x63   :  { %206 = vadd.xlane.f32.xlu2 %v205_v22  ;;  %v226_v22 = vsel %vm90_vm0, %v2249_v3, 0.0 }
  0x64   :  { %203 = vadd.xlane.f32.xlu1 %v202_v21 }
  0x65   :  { %200 = vadd.xlane.f32.xlu0 %v199_v23  ;;  %v229_v23 = vsel %vm90_vm0, %v2254_v4, 0.0 }
  0x6b   :  { %215 = vadd.xlane.f32.xlu2 %v214_v32  ;;  %v2276_v32 = vld [vmem:[%s3755_s0 + $0x138] sm:$0xff] }
  0x6c   :  { %212 = vadd.xlane.f32.xlu1 %v211_v29  ;;  %v262_v29 = vsel %vm90_vm0, %v2263_v14, 0.0 }
  0x6d   :  { %209 = vadd.xlane.f32.xlu0 %v208_v33  ;;  %v2281_v33 = vld [vmem:[%s3755_s0 + $0x1a8] sm:$0xff] }
  0x73   :  { %224 = vadd.xlane.f32.xlu2 %v223_v41 }
  0x74   :  { %221 = vadd.xlane.f32.xlu1 %v220_v40 }
  0x75   :  { %218 = vadd.xlane.f32.xlu0 %v217_v45  ;;  %v2290_v45 = vld [vmem:[%s3755_s0 + $0x128] sm:$0xff] }
  0x76   :  { %v2229_v51 = vpop.xlane.xlu2 %104 }
  0x77   :  { %3855 = vst [vmem:[#allocation24_spill] sm:$0xff] %v2229_v51  ;;  %v2231_v52 = vpop.xlane.xlu1 %98 }
  0x78   :  { %v2238_v57 = vpop.xlane.xlu0 %92 }
  0x7b   :  { %260 = vadd.xlane.f32.xlu2 %v259_v59  ;;  %v244_v59 = vsel %vm90_vm0, %v2276_v32, 0.0 }
  0x7c   :  { %239 = vadd.xlane.f32.xlu1 %v238_v58 }
  0x7d   :  { %236 = vadd.xlane.f32.xlu0 %v235_v63  ;;  %v265_v63 = vsel %vm90_vm0, %v2281_v33, 0.0 }
  0x7e   :  { %v2256_v11 = vpop.xlane.xlu2 %107 }
  0x7f   :  { %3858 = vst [vmem:[#allocation27_spill] sm:$0xff] %v2256_v11  ;;  %v2258_v13 = vpop.xlane.xlu1 %101 }
  0x80   :  { %v2265_v21 = vpop.xlane.xlu0 %95 }
  0x83   :  { %230 = vadd.xlane.f32.xlu2 %v229_v23  ;;  %v2303_v23 = vld [vmem:[%s3755_s0 + $0xf8] sm:$0xff] }
  0x84   :  { %227 = vadd.xlane.f32.xlu1 %v226_v22  ;;  %v241_v22 = vsel %vm90_vm0, %v2290_v45, 0.0  ;;  %3861 = vst [vmem:[#allocation30_spill] sm:$0xff] %v2303_v23 }
  0x85   :  { %263 = vadd.xlane.f32.xlu0 %v262_v29  ;;  %v2308_v29 = vld [vmem:[%s3755_s0 + $0x148] sm:$0xff] }
  0x86   :  { %v2283_v40 = vpop.xlane.xlu2 %116  ;;  %3862 = vst [vmem:[#allocation31_spill] sm:$0xff] %v2308_v29  ;;  %v247_v28 = vsel %vm90_vm0, %v2308_v29, 0.0 }
  0x87   :  { %v2285_v41 = vpop.xlane.xlu1 %113 }
  0x88   :  { %3859 = vst [vmem:[#allocation28_spill] sm:$0xff] %v2285_v41  ;;  %v2292_v58 = vpop.xlane.xlu0 %110 }
  0x89   :  { %3860 = vst [vmem:[#allocation29_spill] sm:$0xff] %v2292_v58  ;;  %v2335_v58 = vld [vmem:[%s3755_s0 + $0x1d8] sm:$0xff] }
  0x8a   :  { %3864 = vst [vmem:[#allocation33_spill] sm:$0xff] %v2335_v58  ;;  %v274_v62 = vsel %vm90_vm0, %v2335_v58, 0.0 }
  0x8b   :  { %266 = vadd.xlane.f32.xlu2 %v265_v63 }
  0x8c   :  { %245 = vadd.xlane.f32.xlu1 %v244_v59  ;;  %v2317_v59 = vld [vmem:[%s3755_s0 + $0x1b8] sm:$0xff] }
  0x8d   :  { %242 = vadd.xlane.f32.xlu0 %v241_v22  ;;  %v232_v22 = vsel %vm90_vm0, %v2303_v23, 0.0  ;;  %v268_v41 = vsel %vm90_vm0, %v2317_v59, 0.0 }
  0x8e   :  { %v2310_v16 = vpop.xlane.xlu2 %125 }
  0x8f   :  { %v2312_v4 = vpop.xlane.xlu1 %122 }
  0x90   :  { %v2319_v63 = vpop.xlane.xlu0 %119 }
  0x93   :  { %248 = vadd.xlane.f32.xlu2 %v247_v28 }
  0x94   :  { %233 = vadd.xlane.f32.xlu1 %v232_v22  ;;  %v2344_v22 = vld [vmem:[%s3755_s0 + $0x158] sm:$0xff] }
  0x95   :  { %269 = vadd.xlane.f32.xlu0 %v268_v41  ;;  %3867 = vst [vmem:[#allocation36_spill] sm:$0xff] %v2344_v22  ;;  %v271_v41 = vsel %vm90_vm0, %v2330_v60, 0.0  ;;  %v250_v42 = vsel %vm90_vm0, %v2344_v22, 0.0 }
  0x96   :  { %v2337_v23 = vpop.xlane.xlu2 %134 }
  0x97   :  { %3865 = vst [vmem:[#allocation34_spill] sm:$0xff] %v2337_v23  ;;  %v2339_v43 = vpop.xlane.xlu1 %131  ;;  %v2357_v23 = vld [vmem:[%s3755_s0 + $0x178] sm:$0xff] }
  0x98   :  { %3866 = vst [vmem:[#allocation35_spill] sm:$0xff] %v2339_v43  ;;  %v2346_v28 = vpop.xlane.xlu0 %128 }
  0x99   :  { %3868 = vst [vmem:[#allocation37_spill] sm:$0xff] %v2346_v28 }
  0x9a   :  { %3869 = vst [vmem:[#allocation38_spill] sm:$0xff] %v2357_v23 }
  0x9b   :  { %275 = vadd.xlane.f32.xlu2 %v274_v62  ;;  %v277_v62 = vsel %vm90_vm0, %v2362_v15, 0.0 }
  0x9c   :  { %272 = vadd.xlane.f32.xlu1 %v271_v41 }
  0x9d   :  { %251 = vadd.xlane.f32.xlu0 %v250_v42  ;;  %v256_v42 = vsel %vm90_vm0, %v2357_v23, 0.0 }
  0x9e   :  { %v144_v3 = vpop.xlane.xlu2 %143 }
  0x9f   :  { %v141_v35 = vpop.xlane.xlu1 %140 }
  0xa0   :  { %v2369_v41 = vpop.xlane.xlu0 %137 }
  0xa1   :  { %3872 = vst [vmem:[#allocation41_spill] sm:$0xff] %v2369_v41  ;;  %v2384_v41 = vld [vmem:[%s3755_s0 + $0x1f8] sm:$0xff] }
  0xa2   :  { %3874 = vst [vmem:[#allocation43_spill] sm:$0xff] %v2384_v41  ;;  %v280_v15 = vsel %vm90_vm0, %v2384_v41, 0.0 }
  0xa3   :  { %278 = vadd.xlane.f32.xlu2 %v277_v62 }
  0xa4   :  { %257 = vadd.xlane.f32.xlu1 %v256_v42 }
  0xa5   :  { %254 = vadd.xlane.f32.xlu0 %v253_v25 }
  0xa6   :  { %v2377_v17 = vpop.xlane.xlu2 %152 }
  0xa7   :  { %3873 = vst [vmem:[#allocation42_spill] sm:$0xff] %v2377_v17  ;;  %v2379_v58 = vpop.xlane.xlu1 %149 }
  0xa8   :  { %v2386_v28 = vpop.xlane.xlu0 %146 }
  0xad   :  { %281 = vadd.xlane.f32.xlu0 %v280_v15 }
  0xae   :  { %v2390_v23 = vpop.xlane.xlu2 %161 }
  0xaf   :  { %3875 = vst [vmem:[#allocation44_spill] sm:$0xff] %v2390_v23  ;;  %v2392_v42 = vpop.xlane.xlu1 %158 }
  0xb0   :  { %3876 = vst [vmem:[#allocation45_spill] sm:$0xff] %v2392_v42  ;;  %v2394_v25 = vpop.xlane.xlu0 %155 }
  0xb1   :  { %3877 = vst [vmem:[#allocation46_spill] sm:$0xff] %v2394_v25 }
  0xb6   :  { %v2396_v62 = vpop.xlane.xlu2 %170 }
  0xb7   :  { %v168_v26 = vpop.xlane.xlu1 %167 }
  0xb8   :  { %v165_v43 = vpop.xlane.xlu0 %164 }
  0xbe   :  { %v2398_v0 = vpop.xlane.xlu2 %179 }
  0xbf   :  { %3878 = vst [vmem:[#allocation47_spill] sm:$0xff] %v2398_v0  ;;  %v2400_v6 = vpop.xlane.xlu1 %176 }
  0xc0   :  { %3879 = vst [vmem:[#allocation48_spill] sm:$0xff] %v2400_v6  ;;  %v2402_v29 = vpop.xlane.xlu0 %173 }
  0xc6   :  { %v189_v41 = vpop.xlane.xlu2 %188 }
  0xc7   :  { %v2404_v22 = vpop.xlane.xlu1 %185 }
  0xc8   :  { %3880 = vst [vmem:[#allocation49_spill] sm:$0xff] %v2404_v22  ;;  %v2406_v15 = vpop.xlane.xlu0 %182 }
  0xc9   :  { %3881 = vst [vmem:[#allocation50_spill] sm:$0xff] %v2406_v15 }
  0xce   :  { %v2410_v42 = vpop.xlane.xlu2 %197 }
  0xcf   :  { %v2408_v23 = vpop.xlane.xlu1 %194 }
  0xd0   :  { %v192_v60 = vpop.xlane.xlu0 %191 }
  0xd6   :  { %v2414_v11 = vpop.xlane.xlu2 %206 }
  0xd7   :  { %v2412_v51 = vpop.xlane.xlu1 %203  ;;  %3883 = vst [vmem:[#allocation52_spill] sm:$0xff] %v2414_v11 }
  0xd8   :  { %3882 = vst [vmem:[#allocation51_spill] sm:$0xff] %v2412_v51  ;;  %v2416_v44 = vpop.xlane.xlu0 %200 }
  0xd9   :  { %3884 = vst [vmem:[#allocation53_spill] sm:$0xff] %v2416_v44 }
  0xde   :  { %v216_v55 = vpop.xlane.xlu2 %215 }
  0xdf   :  { %v213_v54 = vpop.xlane.xlu1 %212 }
  0xe0   :  { %v2418_v25 = vpop.xlane.xlu0 %209 }
  0xe1   :  { %3885 = vst [vmem:[#allocation54_spill] sm:$0xff] %v2418_v25 }
  0xe6   :  { %v2422_v22 = vpop.xlane.xlu2 %224 }
  0xe7   :  { %v2420_v39 = vpop.xlane.xlu1 %221  ;;  %3886 = vst [vmem:[#allocation55_spill] sm:$0xff] %v2422_v22 }
  0xe8   :  { %v2424_v15 = vpop.xlane.xlu0 %218 }
  0xee   :  { %v261_v6 = vpop.xlane.xlu2 %260 }
  0xef   :  { %v240_v0 = vpop.xlane.xlu1 %239  ;;  %v307_v34 = vadd.f32 %v261_v6, %v165_v43  ;;  %v283_v6 = vadd.f32 %v189_v41, %v2238_v57 }
  0xf0   :  { %v300_v36 = vadd.f32 %v240_v0, %v144_v3  ;;  %v237_v18 = vpop.xlane.xlu0 %236 }
  0xf1   :  { %v299_v51 = vadd.f32 %v237_v18, %v141_v35  ;;  %v339_v11 = vmul.f32 0.0078125, %v307_v34 }
  0xf2   :  { %v332_v17 = vmul.f32 0.0078125, %v300_v36 }
  0xf3   :  { %v331_v9 = vmul.f32 0.0078125, %v299_v51  ;;  %v2430_v25 = vsub.f32 %v2085_v50, %v339_v11  ;;  %v315_v51 = vmul.f32 0.0078125, %v283_v6 }
  0xf4   :  { %v2427_v44 = vsub.f32 %v2015_v30, %v332_v17  ;;  %v2443_v30 = vsub.f32 %v2222_v46, %v332_v17 }
  0xf5   :  { %3888 = vst [vmem:[#allocation57_spill] sm:$0xff] %v2430_v25  ;;  %v2433_v5 = vsub.f32 %v2020_v31, %v331_v9  ;;  %v435_v0 = vmul.f32 %v2430_v25, %v2430_v25  ;;  %v2446_v36 = vsub.f32 %v2236_v53, %v331_v9  ;;  %v2459_v53 = vsub.f32 %v1929_v2, %v315_v51 }
  0xf6   :  { %3887 = vst [vmem:[#allocation56_spill] sm:$0xff] %v2427_v44  ;;  %v428_v22 = vmul.f32 %v2427_v44, %v2427_v44  ;;  %v556_v17 = vmul.f32 %v2443_v30, %v2443_v30 }
  0xf7   :  { %3889 = vst [vmem:[#allocation58_spill] sm:$0xff] %v2433_v5  ;;  %v427_v18 = vmul.f32 %v2433_v5, %v2433_v5  ;;  %v515_v50 = vsel %vm90_vm0, %v435_v0, 0.0  ;;  %v555_v9 = vmul.f32 %v2446_v36, %v2446_v36 }
  0xf8   :  { %v264_v43 = vpop.xlane.xlu0 %263  ;;  %v494_v31 = vsel %vm90_vm0, %v428_v22, 0.0  ;;  %516 = vadd.xlane.f32.xlu0 %v515_v50  ;;  %3891 = vst [vmem:[#allocation60_spill] sm:$0xff] %v2459_v53  ;;  %v292_v22 = vadd.f32 %v216_v55, %v2319_v63  ;;  %v622_v0 = vsel %vm90_vm0, %v556_v17, 0.0 }
  0xf9   :  { %v308_v34 = vadd.f32 %v264_v43, %v168_v26  ;;  %495 = vadd.xlane.f32.xlu2 %v494_v31  ;;  %v491_v35 = vsel %vm90_vm0, %v427_v18, 0.0  ;;  %v291_v26 = vadd.f32 %v213_v54, %v2283_v40  ;;  %v619_v6 = vsel %vm90_vm0, %v555_v9, 0.0  ;;  %v2475_v54 = vpop.xlane.xlu1 %227 }
  0xfa   :  { %492 = vadd.xlane.f32.xlu1 %v491_v35  ;;  %v2472_v18 = vsub.f32 %v2227_v47, %v339_v11  ;;  %v324_v40 = vmul.f32 0.0078125, %v292_v22 }
  0xfb   :  { %v340_v57 = vmul.f32 0.0078125, %v308_v34  ;;  %v323_v55 = vmul.f32 0.0078125, %v291_v26 }
  0xfc   :  { %v2487_v11 = vsub.f32 %v1986_v20, %v324_v40 }
  0xfd   :  { %v2456_v46 = vsub.f32 %v2080_v49, %v340_v57  ;;  %v2466_v41 = vsub.f32 %v2263_v14, %v340_v57  ;;  %v284_v49 = vadd.f32 %v192_v60, %v2265_v21  ;;  %v411_v14 = vmul.f32 %v2459_v53, %v2459_v53  ;;  %v2495_v57 = vpop.xlane.xlu2 %230 }
  0xfe   :  { %v563_v60 = vmul.f32 %v2472_v18, %v2472_v18  ;;  %v2484_v47 = vsub.f32 %v1961_v12, %v323_v55  ;;  %3893 = vst [vmem:[#allocation62_spill] sm:$0xff] %v2487_v11  ;;  %v420_v12 = vmul.f32 %v2487_v11, %v2487_v11  ;;  %v2507_v26 = vsub.f32 %v2180_v24, %v323_v55 }
  0xff   :  { %3890 = vst [vmem:[#allocation59_spill] sm:$0xff] %v2456_v46  ;;  %v436_v3 = vmul.f32 %v2456_v46, %v2456_v46  ;;  %v564_v63 = vmul.f32 %v2466_v41, %v2466_v41  ;;  %v316_v43 = vmul.f32 0.0078125, %v284_v49  ;;  %v443_v21 = vsel %vm90_vm0, %v411_v14, 0.0 }
 0x100   :  { %623 = vadd.xlane.f32.xlu0 %v622_v0  ;;  %3892 = vst [vmem:[#allocation61_spill] sm:$0xff] %v2484_v47  ;;  %v643_v34 = vsel %vm90_vm0, %v563_v60, 0.0  ;;  %v243_v35 = vpop.xlane.xlu0 %242  ;;  %v419_v20 = vmul.f32 %v2484_v47, %v2484_v47  ;;  %v470_v0 = vsel %vm90_vm0, %v420_v12, 0.0  ;;  %v2514_v49 = vsub.f32 %v2122_v61, %v315_v51 }
 0x101   :  { %620 = vadd.xlane.f32.xlu2 %v619_v6  ;;  %v518_v2 = vsel %vm90_vm0, %v436_v3, 0.0  ;;  %v646_v31 = vsel %vm90_vm0, %v564_v63, 0.0  ;;  %v2492_v50 = vsub.f32 %v1950_v8, %v316_v43  ;;  %v246_v17 = vpop.xlane.xlu1 %245  ;;  %v2504_v8 = vsub.f32 %v2148_v10, %v316_v43 }
 0x102   :  { %519 = vadd.xlane.f32.xlu1 %v518_v2  ;;  %v302_v3 = vadd.f32 %v246_v17, %v2379_v58  ;;  %v301_v22 = vadd.f32 %v243_v35, %v2386_v28  ;;  %v467_v6 = vsel %vm90_vm0, %v419_v20, 0.0  ;;  %v547_v58 = vmul.f32 %v2507_v26, %v2507_v26 }
 0x103   :  { %3894 = vst [vmem:[#allocation63_spill] sm:$0xff] %v2492_v50  ;;  %v412_v9 = vmul.f32 %v2492_v50, %v2492_v50  ;;  %v540_v10 = vmul.f32 %v2504_v8, %v2504_v8  ;;  %v539_v14 = vmul.f32 %v2514_v49, %v2514_v49 }
 0x104   :  { %v334_v24 = vmul.f32 0.0078125, %v302_v3  ;;  %v333_v55 = vmul.f32 0.0078125, %v301_v22 }
 0x105   :  { %v446_v2 = vsel %vm90_vm0, %v412_v9, 0.0  ;;  %v267_v63 = vpop.xlane.xlu2 %266  ;;  %v574_v61 = vsel %vm90_vm0, %v540_v10, 0.0  ;;  %v571_v35 = vsel %vm90_vm0, %v539_v14, 0.0 }
 0x106   :  { %v2525_v51 = vsub.f32 %v2038_v37, %v334_v24  ;;  %v2528_v43 = vsub.f32 %v2043_v38, %v333_v55 }
 0x108   :  { %444 = vadd.xlane.f32.xlu0 %v443_v21  ;;  %v270_v28 = vpop.xlane.xlu0 %269  ;;  %3895 = vst [vmem:[#allocation64_spill] sm:$0xff] %v2525_v51  ;;  %v595_v21 = vsel %vm90_vm0, %v547_v58, 0.0  ;;  %v430_v37 = vmul.f32 %v2525_v51, %v2525_v51  ;;  %v429_v38 = vmul.f32 %v2528_v43, %v2528_v43  ;;  %v285_v58 = vadd.f32 %v2408_v23, %v2231_v52  ;;  %v3957_v51 = vld [vmem:[#allocation40_spill] sm:$0xff] }
 0x109   :  { %647 = vadd.xlane.f32.xlu2 %v646_v31  ;;  %3896 = vst [vmem:[#allocation65_spill] sm:$0xff] %v2528_v43  ;;  %v310_v60 = vadd.f32 %v270_v28, %v2402_v29  ;;  %v2533_v31 = vsub.f32 %v2185_v27, %v324_v40  ;;  %v2544_v27 = vsub.f32 %v2290_v45, %v333_v55 }
 0x10a   :  { %644 = vadd.xlane.f32.xlu1 %v643_v34  ;;  %v309_v34 = vadd.f32 %v267_v63, %v2396_v62  ;;  %v500_v40 = vsel %vm90_vm0, %v430_v37, 0.0  ;;  %v497_v17 = vsel %vm90_vm0, %v429_v38, 0.0  ;;  %v2576_v28 = vsub.f32 %v2276_v32, %v334_v24  ;;  %v3904_v38 = vld [vmem:[#allocation42_spill] sm:$0xff] }
 0x10b   :  { %v342_v12 = vmul.f32 0.0078125, %v310_v60  ;;  %v548_v20 = vmul.f32 %v2533_v31, %v2533_v31  ;;  %v557_v22 = vmul.f32 %v2544_v27, %v2544_v27 }
 0x10c   :  { %v341_v29 = vmul.f32 0.0078125, %v309_v34  ;;  %v558_v52 = vmul.f32 %v2576_v28, %v2576_v28 }
 0x10d   :  { %v2547_v62 = vsub.f32 %v2106_v56, %v342_v12  ;;  %v598_v3 = vsel %vm90_vm0, %v548_v20, 0.0  ;;  %v625_v10 = vsel %vm90_vm0, %v557_v22, 0.0 }
 0x10e   :  { %v2552_v9 = vsub.f32 %v2075_v48, %v341_v29  ;;  %v293_v48 = vadd.f32 %v2424_v15, %v2312_v4  ;;  %v317_v15 = vmul.f32 0.0078125, %v285_v58  ;;  %v628_v60 = vsel %vm90_vm0, %v558_v52, 0.0 }
 0x10f   :  { %3897 = vst [vmem:[#allocation66_spill] sm:$0xff] %v2547_v62  ;;  %v438_v45 = vmul.f32 %v2547_v62, %v2547_v62 }
 0x110   :  { %471 = vadd.xlane.f32.xlu0 %v470_v0  ;;  %3898 = vst [vmem:[#allocation67_spill] sm:$0xff] %v2552_v9  ;;  %v437_v56 = vmul.f32 %v2552_v9, %v2552_v9  ;;  %v286_v0 = vadd.f32 %v2410_v42, %v2258_v13  ;;  %v2594_v63 = vsub.f32 %v1924_v1, %v317_v15  ;;  %v252_v58 = vpop.xlane.xlu0 %251 }
 0x111   :  { %468 = vadd.xlane.f32.xlu2 %v467_v6  ;;  %v2566_v6 = vsub.f32 %v2281_v33, %v341_v29  ;;  %v524_v55 = vsel %vm90_vm0, %v438_v45, 0.0  ;;  %v325_v33 = vmul.f32 0.0078125, %v293_v48 }
 0x112   :  { %447 = vadd.xlane.f32.xlu1 %v446_v2  ;;  %v2569_v2 = vsub.f32 %v2317_v59, %v342_v12  ;;  %v521_v13 = vsel %vm90_vm0, %v437_v56, 0.0  ;;  %v318_v4 = vmul.f32 0.0078125, %v286_v0  ;;  %3901 = vst [vmem:[#allocation70_spill] sm:$0xff] %v2594_v63  ;;  %v413_v1 = vmul.f32 %v2594_v63, %v2594_v63  ;;  %v3902_v12 = vld [vmem:[#allocation15_spill] sm:$0xff] }
 0x113   :  { %v565_v42 = vmul.f32 %v2566_v6, %v2566_v6  ;;  %v2589_v23 = vsub.f32 %v1981_v19, %v325_v33 }
 0x114   :  { %v566_v59 = vmul.f32 %v2569_v2, %v2569_v2  ;;  %v2586_v32 = vsub.f32 %v1945_v7, %v318_v4  ;;  %v2599_v7 = vpop.xlane.xlu1 %233  ;;  %v449_v22 = vsel %vm90_vm0, %v413_v1, 0.0 }
 0x115   :  { %3900 = vst [vmem:[#allocation69_spill] sm:$0xff] %v2589_v23  ;;  %v649_v14 = vsel %vm90_vm0, %v565_v42, 0.0  ;;  %v421_v19 = vmul.f32 %v2589_v23, %v2589_v23 }
 0x116   :  { %3899 = vst [vmem:[#allocation68_spill] sm:$0xff] %v2586_v32  ;;  %v652_v24 = vsel %vm90_vm0, %v566_v59, 0.0  ;;  %v414_v34 = vmul.f32 %v2586_v32, %v2586_v32  ;;  %v3907_v59 = vld [vmem:[#allocation21_spill] sm:$0xff]  ;;  %v3955_v32 = vld [vmem:[#allocation38_spill] sm:$0xff] }
 0x117   :  { %v473_v20 = vsel %vm90_vm0, %v421_v19, 0.0 }
 0x118   :  { %596 = vadd.xlane.f32.xlu0 %v595_v21  ;;  %v249_v21 = vpop.xlane.xlu2 %248 }
 0x119   :  { %575 = vadd.xlane.f32.xlu2 %v574_v61  ;;  %v294_v61 = vadd.f32 %v2420_v39, %v2310_v16  ;;  %v2608_v16 = vsub.f32 %v3902_v12, %v317_v15  ;;  %v3903_v39 = vld [vmem:[#allocation16_spill] sm:$0xff]  ;;  %v303_v29 = vadd.f32 %v249_v21, %v3904_v38  ;;  %v3908_v15 = vld [vmem:[#allocation7_spill] sm:$0xff] }
 0x11a   :  { %572 = vadd.xlane.f32.xlu1 %v571_v35  ;;  %v2611_v37 = vsub.f32 %v3903_v39, %v318_v4  ;;  %v3912_v21 = vld [vmem:[#allocation23_spill] sm:$0xff] }
 0x11b   :  { %v326_v35 = vmul.f32 0.0078125, %v294_v61  ;;  %v541_v56 = vmul.f32 %v2608_v16, %v2608_v16  ;;  %v335_v0 = vmul.f32 0.0078125, %v303_v29  ;;  %v3911_v61 = vld [vmem:[#allocation47_spill] sm:$0xff]  ;;  %v2637_v19 = vsub.f32 %v3912_v21, %v325_v33 }
 0x11c   :  { %v542_v45 = vmul.f32 %v2611_v37, %v2611_v37  ;;  %v273_v48 = vpop.xlane.xlu1 %272 }
 0x11d   :  { %v577_v4 = vsel %vm90_vm0, %v541_v56, 0.0  ;;  %v2629_v42 = vsub.f32 %v3907_v59, %v326_v35  ;;  %v2632_v52 = vsub.f32 %v3908_v15, %v335_v0  ;;  %v549_v33 = vmul.f32 %v2637_v19, %v2637_v19  ;;  %v3920_v15 = vld [vmem:[#allocation27_spill] sm:$0xff] }
 0x11f   :  { %3909 = vst [vmem:[#allocation16_spill] sm:$0xff] %v2632_v52  ;;  %v431_v38 = vmul.f32 %v2632_v52, %v2632_v52  ;;  %v550_v29 = vmul.f32 %v2629_v42, %v2629_v42 }
 0x120   :  { %501 = vadd.xlane.f32.xlu0 %v500_v40  ;;  %v452_v40 = vsel %vm90_vm0, %v414_v34, 0.0  ;;  %v3913_v34 = vld [vmem:[#allocation46_spill] sm:$0xff] }
 0x121   :  { %498 = vadd.xlane.f32.xlu2 %v497_v17  ;;  %v3905_v17 = vld [vmem:[#allocation4_spill] sm:$0xff]  ;;  %v304_v1 = vadd.f32 %v252_v58, %v3913_v34  ;;  %v503_v56 = vsel %vm90_vm0, %v431_v38, 0.0  ;;  %v601_v58 = vsel %vm90_vm0, %v549_v33, 0.0 }
 0x122   :  { %599 = vadd.xlane.f32.xlu1 %v598_v3  ;;  %v2617_v3 = vsub.f32 %v3905_v17, %v326_v35  ;;  %v3924_v34 = vld [vmem:[#allocation32_spill] sm:$0xff] }
 0x124   :  { %3906 = vst [vmem:[#allocation15_spill] sm:$0xff] %v2617_v3 }
 0x128   :  { %626 = vadd.xlane.f32.xlu0 %v625_v10  ;;  %v276_v10 = vpop.xlane.xlu2 %275 }
 0x129   :  { %525 = vadd.xlane.f32.xlu2 %v524_v55  ;;  %v422_v55 = vmul.f32 %v2617_v3, %v2617_v3  ;;  %v3945_v3 = vld [vmem:[#allocation45_spill] sm:$0xff] }
 0x12a   :  { %522 = vadd.xlane.f32.xlu1 %v521_v13  ;;  %v580_v13 = vsel %vm90_vm0, %v542_v45, 0.0 }
 0x12b   :  { %v476_v12 = vsel %vm90_vm0, %v422_v55, 0.0 }
 0x130   :  { %653 = vadd.xlane.f32.xlu0 %v652_v24  ;;  %v3910_v24 = vld [vmem:[#allocation48_spill] sm:$0xff] }
 0x131   :  { %650 = vadd.xlane.f32.xlu2 %v649_v14  ;;  %v311_v14 = vadd.f32 %v273_v48, %v3910_v24  ;;  %v604_v48 = vsel %vm90_vm0, %v550_v29, 0.0  ;;  %v3921_v24 = vld [vmem:[#allocation51_spill] sm:$0xff] }
 0x132   :  { %629 = vadd.xlane.f32.xlu1 %v628_v60  ;;  %v312_v60 = vadd.f32 %v276_v10, %v3911_v61  ;;  %v3918_v10 = vld [vmem:[#allocation10_spill] sm:$0xff]  ;;  %v3922_v61 = vld [vmem:[#allocation24_spill] sm:$0xff] }
 0x133   :  { %v343_v39 = vmul.f32 0.0078125, %v311_v14  ;;  %v288_v14 = vadd.f32 %v3921_v24, %v3920_v15  ;;  %v3931_v24 = vld [vmem:[#allocation35_spill] sm:$0xff] }
 0x134   :  { %v344_v35 = vmul.f32 0.0078125, %v312_v60  ;;  %v3923_v60 = vld [vmem:[#allocation53_spill] sm:$0xff] }
 0x135   :  { %v287_v21 = vadd.f32 %v3923_v60, %v3922_v61  ;;  %v3932_v60 = vld [vmem:[#allocation37_spill] sm:$0xff] }
 0x138   :  { %474 = vadd.xlane.f32.xlu0 %v473_v20  ;;  %v336_v20 = vmul.f32 0.0078125, %v304_v1  ;;  %v2670_v1 = vsub.f32 %v3924_v34, %v343_v39 }
 0x139   :  { %453 = vadd.xlane.f32.xlu2 %v452_v40  ;;  %v3914_v40 = vld [vmem:[#allocation12_spill] sm:$0xff] }
 0x13a   :  { %450 = vadd.xlane.f32.xlu1 %v449_v22  ;;  %v2648_v17 = vsub.f32 %v3914_v40, %v343_v39  ;;  %v3916_v22 = vld [vmem:[#allocation11_spill] sm:$0xff]  ;;  %v2656_v55 = vsub.f32 %v3918_v10, %v336_v20  ;;  %v319_v10 = vmul.f32 0.0078125, %v287_v21  ;;  %v567_v39 = vmul.f32 %v2670_v1, %v2670_v1 }
 0x13b   :  { %v2651_v45 = vsub.f32 %v3916_v22, %v344_v35  ;;  %v3926_v40 = vld [vmem:[#allocation31_spill] sm:$0xff] }
 0x13c   :  { %3915 = vst [vmem:[#allocation42_spill] sm:$0xff] %v2648_v17  ;;  %v432_v59 = vmul.f32 %v2656_v55, %v2656_v55  ;;  %v2678_v22 = vsub.f32 %v3926_v40, %v335_v0  ;;  %v3929_v0 = vld [vmem:[#allocation2_spill] sm:$0xff]  ;;  %v3933_v21 = vld [vmem:[#allocation55_spill] sm:$0xff]  ;;  %v255_v40 = vpop.xlane.xlu0 %254 }
 0x13d   :  { %3917 = vst [vmem:[#allocation4_spill] sm:$0xff] %v2651_v45  ;;  %v2691_v15 = vsub.f32 %v3929_v0, %v319_v10  ;;  %v295_v34 = vadd.f32 %v3933_v21, %v3932_v60  ;;  %v3935_v0 = vld [vmem:[#allocation19_spill] sm:$0xff]  ;;  %v305_v23 = vadd.f32 %v255_v40, %v3945_v3 }
 0x13e   :  { %3919 = vst [vmem:[#allocation21_spill] sm:$0xff] %v2656_v55 }
 0x13f   :  { %3930 = vst [vmem:[#allocation48_spill] sm:$0xff] %v2691_v15 }
 0x140   :  { %581 = vadd.xlane.f32.xlu0 %v580_v13  ;;  %v440_v13 = vmul.f32 %v2651_v45, %v2651_v45 }
 0x141   :  { %578 = vadd.xlane.f32.xlu2 %v577_v4  ;;  %v439_v4 = vmul.f32 %v2648_v17, %v2648_v17  ;;  %v3944_v17 = vld [vmem:[#allocation17_spill] sm:$0xff] }
 0x142   :  { %477 = vadd.xlane.f32.xlu1 %v476_v12  ;;  %v3925_v12 = vld [vmem:[#allocation36_spill] sm:$0xff]  ;;  %v530_v29 = vsel %vm90_vm0, %v440_v13, 0.0  ;;  %v3927_v13 = vld [vmem:[#allocation3_spill] sm:$0xff] }
 0x143   :  { %v2673_v38 = vsub.f32 %v3925_v12, %v336_v20  ;;  %v527_v33 = vsel %vm90_vm0, %v439_v4, 0.0  ;;  %v3934_v12 = vld [vmem:[#allocation33_spill] sm:$0xff] }
 0x145   :  { %v560_v20 = vmul.f32 %v2673_v38, %v2673_v38 }
 0x147   :  { %v634_v61 = vsel %vm90_vm0, %v560_v20, 0.0  ;;  %v327_v20 = vmul.f32 0.0078125, %v295_v34 }
 0x148   :  { %504 = vadd.xlane.f32.xlu0 %v503_v56  ;;  %v506_v56 = vsel %vm90_vm0, %v432_v59, 0.0  ;;  %v296_v59 = vadd.f32 %v2475_v54, %v3931_v24  ;;  %v3936_v24 = vld [vmem:[#allocation5_spill] sm:$0xff] }
 0x149   :  { %605 = vadd.xlane.f32.xlu2 %v604_v48  ;;  %v320_v48 = vmul.f32 0.0078125, %v288_v14  ;;  %v655_v14 = vsel %vm90_vm0, %v567_v39, 0.0  ;;  %v415_v39 = vmul.f32 %v2691_v15, %v2691_v15 }
 0x14a   :  { %602 = vadd.xlane.f32.xlu1 %v601_v58  ;;  %v559_v58 = vmul.f32 %v2678_v22, %v2678_v22 }
 0x14b   :  { %v2688_v4 = vsub.f32 %v3927_v13, %v320_v48 }
 0x14d   :  { %3928 = vst [vmem:[#allocation7_spill] sm:$0xff] %v2688_v4  ;;  %v416_v54 = vmul.f32 %v2688_v4, %v2688_v4  ;;  %v3943_v4 = vld [vmem:[#allocation50_spill] sm:$0xff] }
 0x150   :  { %531 = vadd.xlane.f32.xlu0 %v530_v29  ;;  %v2700_v29 = vsub.f32 %v3934_v12, %v344_v35  ;;  %v2710_v35 = vsub.f32 %v3935_v0, %v319_v10  ;;  %v279_v10 = vpop.xlane.xlu2 %278  ;;  %v282_v12 = vpop.xlane.xlu0 %281 }
 0x151   :  { %528 = vadd.xlane.f32.xlu2 %v527_v33  ;;  %v631_v33 = vsel %vm90_vm0, %v559_v58, 0.0  ;;  %v458_v58 = vsel %vm90_vm0, %v416_v54, 0.0  ;;  %v258_v0 = vpop.xlane.xlu1 %257  ;;  %v313_v15 = vadd.f32 %v279_v10, %v3943_v4 }
 0x152   :  { %507 = vadd.xlane.f32.xlu1 %v506_v56  ;;  %v328_v56 = vmul.f32 0.0078125, %v296_v59  ;;  %v568_v13 = vmul.f32 %v2700_v29, %v2700_v29  ;;  %v455_v59 = vsel %vm90_vm0, %v415_v39, 0.0  ;;  %v543_v34 = vmul.f32 %v2710_v35, %v2710_v35  ;;  %v3940_v39 = vld [vmem:[#allocation22_spill] sm:$0xff] }
 0x154   :  { %v658_v21 = vsel %vm90_vm0, %v568_v13, 0.0 }
 0x158   :  { %656 = vadd.xlane.f32.xlu0 %v655_v14  ;;  %v2713_v14 = vsub.f32 %v3936_v24, %v328_v56  ;;  %v2728_v24 = vsub.f32 %v3940_v39, %v327_v20  ;;  %v2742_v39 = vmul.f32 0.0078125, %v313_v15 }
 0x159   :  { %635 = vadd.xlane.f32.xlu2 %v634_v61  ;;  %v3938_v61 = vld [vmem:[#allocation6_spill] sm:$0xff] }
 0x15a   :  { %632 = vadd.xlane.f32.xlu1 %v631_v33  ;;  %3937 = vst [vmem:[#allocation47_spill] sm:$0xff] %v2713_v14  ;;  %v2718_v60 = vsub.f32 %v3938_v61, %v327_v20  ;;  %v424_v33 = vmul.f32 %v2713_v14, %v2713_v14  ;;  %v3942_v61 = vld [vmem:[#allocation44_spill] sm:$0xff]  ;;  %v2738_v14 = vsub.f32 %v3944_v17, %v320_v48  ;;  %v337_v17 = vmul.f32 0.0078125, %v305_v23 }
 0x15b   :  { %v551_v10 = vmul.f32 %v2728_v24, %v2728_v24 }
 0x15c   :  { %3939 = vst [vmem:[#allocation23_spill] sm:$0xff] %v2718_v60  ;;  %v423_v54 = vmul.f32 %v2718_v60, %v2718_v60  ;;  %v482_v45 = vsel %vm90_vm0, %v424_v33, 0.0  ;;  %v544_v3 = vmul.f32 %v2738_v14, %v2738_v14  ;;  %v3948_v33 = vld [vmem:[#allocation14_spill] sm:$0xff] }
 0x15d   :  { %v2755_v15 = vsub.f32 %v3948_v33, %v2742_v39 }
 0x15e   :  { %v479_v20 = vsel %vm90_vm0, %v423_v54, 0.0  ;;  %v607_v54 = vsel %vm90_vm0, %v551_v10, 0.0 }
 0x15f   :  { %3949 = vst [vmem:[#allocation12_spill] sm:$0xff] %v2755_v15  ;;  %v441_v33 = vmul.f32 %v2755_v15, %v2755_v15  ;;  %v2776_v15 = vsub.f32 %v3957_v51, %v337_v17 }
 0x160   :  { %459 = vadd.xlane.f32.xlu0 %v458_v58  ;;  %v583_v58 = vsel %vm90_vm0, %v543_v34, 0.0 }
 0x161   :  { %456 = vadd.xlane.f32.xlu2 %v455_v59  ;;  %v3941_v59 = vld [vmem:[#allocation25_spill] sm:$0xff]  ;;  %3958 = vst [vmem:[#allocation27_spill] sm:$0xff] %v2776_v15 }
 0x162   :  { %659 = vadd.xlane.f32.xlu1 %v658_v21  ;;  %v2732_v13 = vsub.f32 %v3941_v59, %v328_v56  ;;  %v306_v21 = vadd.f32 %v258_v0, %v3942_v61 }
 0x164   :  { %v338_v34 = vmul.f32 0.0078125, %v306_v21  ;;  %v552_v4 = vmul.f32 %v2732_v13, %v2732_v13  ;;  %v3952_v21 = vld [vmem:[#allocation49_spill] sm:$0xff] }
 0x165   :  { %v314_v23 = vadd.f32 %v282_v12, %v3952_v21 }
 0x166   :  { %v610_v0 = vsel %vm90_vm0, %v552_v4, 0.0  ;;  %v2773_v63 = vsub.f32 %v3955_v32, %v338_v34 }
 0x167   :  { %v346_v52 = vmul.f32 0.0078125, %v314_v23  ;;  %v3959_v23 = vld [vmem:[#allocation13_spill] sm:$0xff] }
 0x168   :  { %584 = vadd.xlane.f32.xlu0 %v583_v58  ;;  %v3950_v58 = vld [vmem:[#allocation9_spill] sm:$0xff]  ;;  %3956 = vst [vmem:[#allocation10_spill] sm:$0xff] %v2773_v63 }
 0x169   :  { %483 = vadd.xlane.f32.xlu2 %v482_v45  ;;  %v3946_v45 = vld [vmem:[#allocation8_spill] sm:$0xff]  ;;  %v2760_v61 = vsub.f32 %v3950_v58, %v337_v17  ;;  %v562_v17 = vmul.f32 %v2773_v63, %v2773_v63 }
 0x16a   :  { %480 = vadd.xlane.f32.xlu1 %v479_v20  ;;  %v2751_v40 = vsub.f32 %v3946_v45, %v338_v34  ;;  %v586_v20 = vsel %vm90_vm0, %v544_v3, 0.0 }
 0x16b   :  { %v517_v59 = vpop.xlane.xlu0 %516  ;;  %3951 = vst [vmem:[#allocation11_spill] sm:$0xff] %v2760_v61  ;;  %v433_v12 = vmul.f32 %v2760_v61, %v2760_v61 }
 0x16c   :  { %v496_v56 = vpop.xlane.xlu2 %495  ;;  %3947 = vst [vmem:[#allocation46_spill] sm:$0xff] %v2751_v40  ;;  %v434_v4 = vmul.f32 %v2751_v40, %v2751_v40  ;;  %v533_v40 = vsel %vm90_vm0, %v441_v33, 0.0  ;;  %v561_v33 = vmul.f32 %v2776_v15, %v2776_v15 }
 0x16d   :  { %v493_v48 = vpop.xlane.xlu1 %492 }
 0x170   :  { %611 = vadd.xlane.f32.xlu0 %v610_v0  ;;  %v3953_v0 = vld [vmem:[#allocation29_spill] sm:$0xff] }
 0x171   :  { %608 = vadd.xlane.f32.xlu2 %v607_v54  ;;  %v3954_v54 = vld [vmem:[#allocation52_spill] sm:$0xff] }
 0x172   :  { %587 = vadd.xlane.f32.xlu1 %v586_v20  ;;  %v289_v21 = vadd.f32 %v3954_v54, %v3953_v0 }
 0x173   :  { %v624_v60 = vpop.xlane.xlu0 %623 }
 0x174   :  { %v621_v45 = vpop.xlane.xlu2 %620  ;;  %v684_v58 = vadd.f32 %v624_v60, %v496_v56  ;;  %v2781_v60 = vsub.f32 %v3959_v23, %v346_v52  ;;  %v2788_v32 = vmul.f32 0.0078125, %v289_v21  ;;  %v1869_v21 = vld [vmem:[%s3755_s0 + $0x60] sm:$0xff]  ;;  %v3964_v23 = vld [vmem:[#allocation43_spill] sm:$0xff] }
 0x175   :  { %v683_v10 = vadd.f32 %v621_v45, %v493_v48  ;;  %v520_v55 = vpop.xlane.xlu1 %519  ;;  %v512_v48 = vsel %vm90_vm0, %v434_v4, 0.0  ;;  %v509_v45 = vsel %vm90_vm0, %v433_v12, 0.0  ;;  %v3961_v12 = vld [vmem:[#allocation34_spill] sm:$0xff] }
 0x176   :  { %v716_v20 = vmul.f32 0.0078125, %v684_v58  ;;  %3960 = vst [vmem:[#allocation51_spill] sm:$0xff] %v2781_v60  ;;  %v442_v58 = vmul.f32 %v2781_v60, %v2781_v60  ;;  %v297_v0 = vadd.f32 %v2495_v57, %v3961_v12  ;;  %v640_v57 = vsel %vm90_vm0, %v562_v17, 0.0  ;;  %v3967_v60 = vld [vmem:[#allocation54_spill] sm:$0xff] }
 0x177   :  { %v715_v3 = vmul.f32 0.0078125, %v683_v10  ;;  %v637_v12 = vsel %vm90_vm0, %v561_v33, 0.0 }
 0x178   :  { %534 = vadd.xlane.f32.xlu0 %v533_v40  ;;  %v2786_v10 = vadd.f32 1e-05, %v716_v20  ;;  %v3963_v20 = vld [vmem:[#allocation41_spill] sm:$0xff] }
 0x179   :  { %v2783_v56 = vadd.f32 1e-05, %v715_v3  ;;  %513 = vadd.xlane.f32.xlu2 %v512_v48  ;;  %v2806_v3 = vsub.f32 %v1869_v21, %v2788_v32  ;;  %v3968_v21 = vld [vmem:[#allocation39_spill] sm:$0xff] }
 0x17a   :  { %510 = vadd.xlane.f32.xlu1 %v509_v45  ;;  %v2811_v45 = vsub.f32 %v3964_v23, %v346_v52  ;;  %v2821_v43 = vsub.f32 %v3968_v21, %v2742_v39  ;;  %v329_v52 = vmul.f32 0.0078125, %v297_v0  ;;  %vm939_vm6 = vweird.f32 %v2786_v10 }
 0x17b   :  { %1805 = vrsqrt.f32 %v2783_v56  ;;  %v2791_v34 = vpop.xlane.xlu0 %444  ;;  %3962 = vst [vmem:[#allocation24_spill] sm:$0xff] %v2806_v3  ;;  %vm929_vm2 = vweird.f32 %v2783_v56 }
 0x17c   :  { %v648_v51 = vpop.xlane.xlu2 %647  ;;  %1807 = vrsqrt.f32 %v2786_v10  ;;  %3965 = vst [vmem:[#allocation53_spill] sm:$0xff] %v2811_v45  ;;  %v570_v0 = vmul.f32 %v2811_v45, %v2811_v45  ;;  %v569_v23 = vmul.f32 %v2821_v43, %v2821_v43 }
 0x17d   :  { %v692_v40 = vadd.f32 %v648_v51, %v520_v55  ;;  %v645_v4 = vpop.xlane.xlu1 %644  ;;  %v298_v55 = vadd.f32 %v2599_v7, %v3963_v20  ;;  %3969 = vst [vmem:[#allocation32_spill] sm:$0xff] %v2821_v43  ;;  %v536_v7 = vsel %vm90_vm0, %v442_v58, 0.0  ;;  %v417_v58 = vmul.f32 %v2806_v3, %v2806_v3  ;;  %v3973_v43 = vld [vmem:[#allocation20_spill] sm:$0xff] }
 0x17e   :  { %v691_v54 = vadd.f32 %v645_v4, %v517_v59  ;;  %v3966_v4 = vld [vmem:[#allocation28_spill] sm:$0xff]  ;;  %v661_v53 = vsel %vm90_vm0, %v569_v23, 0.0 }
 0x17f   :  { %v724_v48 = vmul.f32 0.0078125, %v692_v40  ;;  %v290_v61 = vadd.f32 %v3967_v60, %v3966_v4  ;;  %v2833_v33 = vmul.f32 0.0078125, %v298_v55  ;;  %v1870_v55 = vld [vmem:[%s3755_s0 + $0xe0] sm:$0xff]  ;;  %v1871_v4 = vld [vmem:[%s3755_s0 + $0xf0] sm:$0xff]  ;;  %v461_v21 = vsel %vm90_vm0, %v417_v58, 0.0 }
 0x180   :  { %v723_v51 = vmul.f32 0.0078125, %v691_v54  ;;  %641 = vadd.xlane.f32.xlu0 %v640_v57 }
 0x181   :  { %v2815_v59 = vpop.eup %1805  ;;  %v2823_v50 = vadd.f32 1e-05, %v724_v48  ;;  %638 = vadd.xlane.f32.xlu2 %v637_v12  ;;  %v322_v20 = vmul.f32 0.0078125, %v290_v61  ;;  %v2856_v61 = vsub.f32 %v1871_v4, %v2833_v33 }
 0x182   :  { %v2826_v40 = vadd.f32 1e-05, %v723_v51  ;;  %537 = vadd.xlane.f32.xlu1 %v536_v7  ;;  %v924_v17 = vmul.f32 %v2815_v59, %v2783_v56  ;;  %v2831_v60 = vpop.eup %1807  ;;  %v2847_v51 = vsub.f32 %v1870_v55, %v329_v52  ;;  %v664_v7 = vsel %vm90_vm0, %v570_v0, 0.0 }
 0x183   :  { %1809 = vrsqrt.f32 %v2823_v50  ;;  %v2836_v54 = vpop.xlane.xlu0 %471  ;;  %v934_v12 = vmul.f32 %v2831_v60, %v2786_v10  ;;  %3971 = vst [vmem:[#allocation31_spill] sm:$0xff] %v2856_v61  ;;  %v426_v23 = vmul.f32 %v2856_v61, %v2856_v61  ;;  %v2881_v11 = vsub.f32 %v3973_v43, %v322_v20 }
 0x184   :  { %1811 = vrsqrt.f32 %v2826_v40  ;;  %v469_v39 = vpop.xlane.xlu2 %468  ;;  %3970 = vst [vmem:[#allocation36_spill] sm:$0xff] %v2847_v51  ;;  %v925_v57 = vmul.f32 %v2815_v59, %v924_v17  ;;  %v1872_v17 = vld [vmem:[%s3755_s0 + $0x70] sm:$0xff]  ;;  %v425_v58 = vmul.f32 %v2847_v51, %v2847_v51  ;;  %vm930_vm1 = vweird.f32 %v2815_v59 }
 0x185   :  { %v448_v48 = vpop.xlane.xlu1 %447  ;;  %v2865_v55 = vsub.f32 %v1872_v17, %v322_v20  ;;  %v935_v9 = vmul.f32 %v2831_v60, %v934_v12  ;;  %v3974_v12 = vld [vmem:[#allocation26_spill] sm:$0xff]  ;;  %vm931_vm3 = vmor %vm929_vm2, %vm930_vm1  ;;  %vm940_vm4 = vweird.f32 %v2831_v60  ;;  %vm1019_vm9 = vweird.f32 %v2823_v50 }
 0x186   :  { %v926_v0 = vmul.f32 0.5, %v925_v57  ;;  %v2887_v15 = vsub.f32 %v3974_v12, %v329_v52  ;;  %v485_v25 = vsel %vm90_vm0, %v425_v58, 0.0  ;;  %vm941_vm8 = vmor %vm939_vm6, %vm940_vm4  ;;  %vm1009_vm11 = vweird.f32 %v2826_v40 }
 0x187   :  { %3972 = vst [vmem:[#allocation3_spill] sm:$0xff] %v2865_v55  ;;  %v418_v57 = vmul.f32 %v2865_v55, %v2865_v55  ;;  %v936_v61 = vmul.f32 0.5, %v935_v9  ;;  %v546_v9 = vmul.f32 %v2881_v11, %v2881_v11 }
 0x188   :  { %462 = vadd.xlane.f32.xlu0 %v461_v21  ;;  %v927_v46 = vsub.f32 1.5, %v926_v0 }
 0x189   :  { %v2860_v3 = vpop.eup %1809  ;;  %665 = vadd.xlane.f32.xlu2 %v664_v7 }
 0x18a   :  { %v2868_v62 = vpop.eup %1811  ;;  %v1014_v4 = vmul.f32 %v2860_v3, %v2823_v50  ;;  %662 = vadd.xlane.f32.xlu1 %v661_v53  ;;  %vm1020_vm5 = vweird.f32 %v2860_v3 }
 0x18b   :  { %v1004_v17 = vmul.f32 %v2868_v62, %v2826_v40  ;;  %v597_v45 = vpop.xlane.xlu0 %596  ;;  %vm1010_vm7 = vweird.f32 %v2868_v62  ;;  %vm1021_vm10 = vmor %vm1019_vm9, %vm1020_vm5 }
 0x18c   :  { %v1015_v21 = vmul.f32 %v2860_v3, %v1014_v4  ;;  %v576_v7 = vpop.xlane.xlu2 %575  ;;  %v675_v47 = vadd.f32 %v597_v45, %v469_v39  ;;  %v928_v45 = vmul.f32 %v2815_v59, %v927_v46  ;;  %v937_v39 = vsub.f32 1.5, %v936_v61  ;;  %vm1011_vm12 = vmor %vm1009_vm11, %vm1010_vm7 }
 0x18d   :  { %v1005_v53 = vmul.f32 %v2868_v62, %v1004_v17  ;;  %v668_v63 = vadd.f32 %v576_v7, %v448_v48  ;;  %v573_v51 = vpop.xlane.xlu1 %572  ;;  %v488_v48 = vsel %vm90_vm0, %v426_v23, 0.0  ;;  %v3975_v7 = vld [vmem:[#allocation18_spill] sm:$0xff]  ;;  %v592_v61 = vsel %vm90_vm0, %v546_v9, 0.0 }
 0x18e   :  { %v667_v4 = vadd.f32 %v573_v51, %v2791_v34  ;;  %v1016_v44 = vmul.f32 0.5, %v1015_v21  ;;  %v707_v17 = vmul.f32 0.0078125, %v675_v47  ;;  %v2894_v55 = vsub.f32 %v3975_v7, %v2788_v32 }
 0x18f   :  { %v700_v43 = vmul.f32 0.0078125, %v668_v63  ;;  %v1006_v20 = vmul.f32 0.5, %v1005_v53  ;;  %v464_v34 = vsel %vm90_vm0, %v418_v57, 0.0  ;;  %v553_v32 = vmul.f32 %v2887_v15, %v2887_v15 }
 0x190   :  { %v699_v5 = vmul.f32 0.0078125, %v667_v4  ;;  %489 = vadd.xlane.f32.xlu0 %v488_v48  ;;  %v2904_v47 = vadd.f32 1e-05, %v707_v17  ;;  %v1017_v51 = vsub.f32 1.5, %v1016_v44  ;;  %v545_v21 = vmul.f32 %v2894_v55, %v2894_v55  ;;  %v3976_v4 = vld [vmem:[#allocation30_spill] sm:$0xff] }
 0x191   :  { %v2896_v52 = vadd.f32 1e-05, %v700_v43  ;;  %486 = vadd.xlane.f32.xlu2 %v485_v25  ;;  %v1007_v25 = vsub.f32 1.5, %v1006_v20  ;;  %v613_v46 = vsel %vm90_vm0, %v553_v32, 0.0  ;;  %v2924_v23 = vsel %vm931_vm3, %v2815_v59, %v928_v45 }
 0x192   :  { %v2902_v63 = vadd.f32 1e-05, %v699_v5  ;;  %465 = vadd.xlane.f32.xlu1 %v464_v34  ;;  %v938_v56 = vmul.f32 %v2831_v60, %v937_v39  ;;  %v1018_v53 = vmul.f32 %v2860_v3, %v1017_v51  ;;  %v2936_v43 = vsub.f32 %v3976_v4, %v2833_v33  ;;  %v2950_v33 = vld [vmem:[%s3756_s2] ss:$0 sm:$0xff] }
 0x193   :  { %1813 = vrsqrt.f32 %v2896_v52  ;;  %v2911_v0 = vpop.xlane.xlu0 %501  ;;  %v1008_v57 = vmul.f32 %v2868_v62, %v1007_v25  ;;  %v589_v59 = vsel %vm90_vm0, %v545_v21, 0.0  ;;  %v1203_v50 = vmul.f32 %v2924_v23, %v2446_v36  ;;  %v2980_v21 = vld [vmem:[%s3757_s4] ss:$0 sm:$0xff] }
 0x194   :  { %1815 = vrsqrt.f32 %v2902_v63  ;;  %v499_v58 = vpop.xlane.xlu2 %498  ;;  %3977 = vst [vmem:[#allocation2_spill] sm:$0xff] %v2936_v43  ;;  %v2957_v7 = vsel %vm941_vm8, %v2831_v60, %v938_v56  ;;  %v2960_v40 = vsel %vm1021_vm10, %v2860_v3, %v1018_v53  ;;  %v554_v25 = vmul.f32 %v2936_v43, %v2936_v43 }
 0x195   :  { %1817 = vrsqrt.f32 %v2904_v47  ;;  %v600_v5 = vpop.xlane.xlu1 %599  ;;  %v2967_v9 = vsel %vm1011_vm12, %v2868_v62, %v1008_v57  ;;  %v1212_v53 = vmul.f32 %v2960_v40, %v2466_v41  ;;  %vm779_vm13 = vweird.f32 %v2896_v52 }
 0x196   :  { %v676_v44 = vadd.f32 %v600_v5, %v2836_v54  ;;  %vm769_vm15 = vweird.f32 %v2902_v63  ;;  %vm849_vm2 = vweird.f32 %v2904_v47 }
 0x198   :  { %v708_v54 = vmul.f32 0.0078125, %v676_v44  ;;  %614 = vadd.xlane.f32.xlu0 %v613_v46  ;;  %v1204_v44 = vmul.f32 %v2957_v7, %v2443_v30  ;;  %v1239_v46 = vmul.f32 %v2950_v33, %v1203_v50 }
 0x199   :  { %v2932_v12 = vpop.eup %1813  ;;  %593 = vadd.xlane.f32.xlu2 %v592_v61 }
 0x19a   :  { %v2940_v20 = vpop.eup %1815  ;;  %v774_v10 = vmul.f32 %v2932_v12, %v2896_v52  ;;  %v2945_v17 = vadd.f32 1e-05, %v708_v54  ;;  %590 = vadd.xlane.f32.xlu1 %v589_v59  ;;  %v1240_v50 = vmul.f32 %v2950_v33, %v1204_v44  ;;  %vm780_vm14 = vweird.f32 %v2932_v12 }
 0x19b   :  { %v2954_v48 = vpop.eup %1817  ;;  %v764_v34 = vmul.f32 %v2940_v20, %v2902_v63  ;;  %v627_v45 = vpop.xlane.xlu0 %626  ;;  %vm770_vm1 = vweird.f32 %v2940_v20  ;;  %vm781_vm4 = vmor %vm779_vm13, %vm780_vm14 }
 0x19c   :  { %v775_v32 = vmul.f32 %v2932_v12, %v774_v10  ;;  %v844_v36 = vmul.f32 %v2954_v48, %v2904_v47  ;;  %1819 = vrsqrt.f32 %v2945_v17  ;;  %v526_v60 = vpop.xlane.xlu2 %525  ;;  %v685_v51 = vadd.f32 %v627_v45, %v499_v58  ;;  %vm771_vm5 = vmor %vm769_vm15, %vm770_vm1 }
 0x19d   :  { %v765_v3 = vmul.f32 %v2940_v20, %v764_v34  ;;  %v523_v39 = vpop.xlane.xlu1 %522  ;;  %v1211_v58 = vmul.f32 %v2967_v9, %v2472_v18  ;;  %v616_v10 = vsel %vm90_vm0, %v554_v25, 0.0  ;;  %vm850_vm3 = vweird.f32 %v2954_v48 }
 0x19e   :  { %v776_v5 = vmul.f32 0.5, %v775_v32  ;;  %v845_v62 = vmul.f32 %v2954_v48, %v844_v36  ;;  %v717_v56 = vmul.f32 0.0078125, %v685_v51  ;;  %v2995_v32 = vadd.f32 %v2980_v21, %v1239_v46  ;;  %vm851_vm7 = vmor %vm849_vm2, %vm850_vm3 }
 0x19f   :  { %v766_v61 = vmul.f32 0.5, %v765_v3  ;;  %v1247_v41 = vmul.f32 %v2950_v33, %v1211_v58  ;;  %v1248_v36 = vmul.f32 %v2950_v33, %v1212_v53  ;;  %vm859_vm8 = vweird.f32 %v2945_v17 }
 0x1a0   :  { %v846_v57 = vmul.f32 0.5, %v845_v62  ;;  %v777_v54 = vsub.f32 1.5, %v776_v5  ;;  %v2989_v59 = vadd.f32 1e-05, %v717_v56 }
 0x1a1   :  { %v767_v4 = vsub.f32 1.5, %v766_v61 }
 0x1a2   :  { %v1820_v34 = vpop.eup %1819  ;;  %v847_v30 = vsub.f32 1.5, %v846_v57  ;;  %617 = vadd.xlane.f32.xlu1 %v616_v10  ;;  %1821 = vrsqrt.f32 %v2989_v59  ;;  %v778_v51 = vmul.f32 %v2932_v12, %v777_v54  ;;  %v1283_v57 = vadd.f32 %v2980_v21, %v1247_v41 }
 0x1a3   :  { %v854_v18 = vmul.f32 %v1820_v34, %v2945_v17  ;;  %v654_v3 = vpop.xlane.xlu0 %653  ;;  %v768_v25 = vmul.f32 %v2940_v20, %v767_v4  ;;  %v1284_v54 = vadd.f32 %v2980_v21, %v1248_v36  ;;  %vm860_vm6 = vweird.f32 %v1820_v34 }
 0x1a4   :  { %v651_v45 = vpop.xlane.xlu2 %650  ;;  %v848_v46 = vmul.f32 %v2954_v48, %v847_v30  ;;  %v694_v56 = vadd.f32 %v654_v3, %v526_v60  ;;  %v1276_v60 = vadd.f32 %v2980_v21, %v1240_v50  ;;  %v3022_v52 = vsel %vm781_vm4, %v2932_v12, %v778_v51  ;;  %vm861_vm9 = vmor %vm859_vm8, %vm860_vm6 }
 0x1a5   :  { %v855_v5 = vmul.f32 %v1820_v34, %v854_v18  ;;  %v630_v62 = vpop.xlane.xlu1 %629  ;;  %v693_v44 = vadd.f32 %v651_v45, %v523_v39  ;;  %v3025_v10 = vsel %vm771_vm5, %v2940_v20, %v768_v25  ;;  %v1726_v20 = vpack.i.bf16 %v1284_v54, %v1283_v57 }
 0x1a6   :  { %v686_v61 = vadd.f32 %v630_v62, %v2911_v0  ;;  %v726_v0 = vmul.f32 0.0078125, %v694_v56  ;;  %v3034_v18 = vsel %vm851_vm7, %v2954_v48, %v848_v46  ;;  %v1187_v3 = vmul.f32 %v3025_v10, %v2514_v49 }
 0x1a7   :  { %v856_v58 = vmul.f32 0.5, %v855_v5  ;;  %v725_v53 = vmul.f32 0.0078125, %v693_v44  ;;  %v1188_v51 = vmul.f32 %v3022_v52, %v2504_v8  ;;  %v1195_v5 = vmul.f32 %v3034_v18, %v2507_v26 }
 0x1a8   :  { %v718_v39 = vmul.f32 0.0078125, %v686_v61  ;;  %v1822_v4 = vpop.eup %1821  ;;  %v3039_v12 = vadd.f32 1e-05, %v726_v0  ;;  %v1721_v49 = vpack.i.bf16 %v1276_v60, %v2995_v32  ;;  %vm949_vm11 = vweird.f32 %v2989_v59 }
 0x1a9   :  { %v857_v30 = vsub.f32 1.5, %v856_v58  ;;  %v3031_v63 = vadd.f32 1e-05, %v725_v53  ;;  %v944_v50 = vmul.f32 %v1822_v4, %v2989_v59  ;;  %v1224_v61 = vmul.f32 %v2950_v33, %v1188_v51 }
 0x1aa   :  { %v3037_v41 = vadd.f32 1e-05, %v718_v39  ;;  %v1231_v58 = vmul.f32 %v2950_v33, %v1195_v5  ;;  %vm950_vm10 = vweird.f32 %v1822_v4  ;;  %vm1039_vm5 = vweird.f32 %v3039_v12 }
 0x1ab   :  { %v858_v36 = vmul.f32 %v1820_v34, %v857_v30  ;;  %1823 = vrsqrt.f32 %v3031_v63  ;;  %v945_v47 = vmul.f32 %v1822_v4, %v944_v50  ;;  %v3045_v48 = vpop.xlane.xlu0 %474  ;;  %vm951_vm12 = vmor %vm949_vm11, %vm950_vm10  ;;  %vm1029_vm13 = vweird.f32 %v3031_v63 }
 0x1ac   :  { %1825 = vrsqrt.f32 %v3037_v41  ;;  %v454_v45 = vpop.xlane.xlu2 %453  ;;  %1727 = vrot.lane.b32.xlu0 %v1726_v20, %s1875_s25  ;;  %v1267_v59 = vadd.f32 %v2980_v21, %v1231_v58  ;;  %vm959_vm2 = vweird.f32 %v3037_v41 }
 0x1ad   :  { %v3051_v25 = vsel %vm861_vm9, %v1820_v34, %v858_v36  ;;  %1827 = vrsqrt.f32 %v3039_v12  ;;  %v451_v17 = vpop.xlane.xlu1 %450  ;;  %v946_v62 = vmul.f32 0.5, %v945_v47  ;;  %v1223_v34 = vmul.f32 %v2950_v33, %v1187_v3 }
 0x1ae   :  { %v1196_v44 = vmul.f32 %v3051_v25, %v2533_v31  ;;  %v1260_v36 = vadd.f32 %v2980_v21, %v1224_v61 }
 0x1af   :  { %v947_v46 = vsub.f32 1.5, %v946_v62  ;;  %v1259_v50 = vadd.f32 %v2980_v21, %v1223_v34 }
 0x1b0   :  { %v1232_v8 = vmul.f32 %v2950_v33, %v1196_v44 }
 0x1b1   :  { %v1824_v56 = vpop.eup %1823  ;;  %1722 = vrot.lane.b32.xlu2 %v1721_v49, %s1875_s25  ;;  %v948_v26 = vmul.f32 %v1822_v4, %v947_v46  ;;  %v1731_v43 = vpack.i.bf16 %v1260_v36, %v1259_v50 }
 0x1b2   :  { %v1826_v53 = vpop.eup %1825  ;;  %v1024_v57 = vmul.f32 %v1824_v56, %v3031_v63  ;;  %v1268_v54 = vadd.f32 %v2980_v21, %v1232_v8  ;;  %vm1030_vm14 = vweird.f32 %v1824_v56 }
 0x1b3   :  { %v1828_v31 = vpop.eup %1827  ;;  %v954_v32 = vmul.f32 %v1826_v53, %v3037_v41  ;;  %v582_v30 = vpop.xlane.xlu0 %581  ;;  %v3073_v5 = vsel %vm951_vm12, %v1822_v4, %v948_v26  ;;  %vm960_vm15 = vweird.f32 %v1826_v53  ;;  %vm1031_vm3 = vmor %vm1029_vm13, %vm1030_vm14 }
 0x1b4   :  { %v1025_v39 = vmul.f32 %v1824_v56, %v1024_v57  ;;  %v1034_v0 = vmul.f32 %v1828_v31, %v3039_v12  ;;  %v579_v60 = vpop.xlane.xlu2 %578  ;;  %v670_v51 = vadd.f32 %v582_v30, %v454_v45  ;;  %v1736_v57 = vpack.i.bf16 %v1268_v54, %v1267_v59  ;;  %vm961_vm4 = vmor %vm959_vm2, %vm960_vm15 }
 0x1b5   :  { %v955_v20 = vmul.f32 %v1826_v53, %v954_v32  ;;  %v478_v47 = vpop.xlane.xlu1 %477  ;;  %v669_v3 = vadd.f32 %v579_v60, %v451_v17  ;;  %vm1040_vm1 = vweird.f32 %v1828_v31  ;;  %v1205_v26 = vmul.f32 %v3073_v5, %v2544_v27 }
 0x1b6   :  { %v1026_v62 = vmul.f32 0.5, %v1025_v39  ;;  %v1035_v44 = vmul.f32 %v1828_v31, %v1034_v0  ;;  %v702_v8 = vmul.f32 0.0078125, %v670_v51  ;;  %vm1041_vm6 = vmor %vm1039_vm5, %vm1040_vm1 }
 0x1b7   :  { %v956_v49 = vmul.f32 0.5, %v955_v20  ;;  %v701_v46 = vmul.f32 0.0078125, %v669_v3  ;;  %v1241_v36 = vmul.f32 %v2950_v33, %v1205_v26 }
 0x1b8   :  { %v1027_v34 = vsub.f32 1.5, %v1026_v62  ;;  %v1036_v61 = vmul.f32 0.5, %v1035_v44  ;;  %v3078_v45 = vadd.f32 1e-05, %v702_v8 }
 0x1b9   :  { %v957_v32 = vsub.f32 1.5, %v956_v49  ;;  %v3076_v17 = vadd.f32 1e-05, %v701_v46  ;;  %1737 = vrot.lane.b32.xlu2 %v1736_v57, %s1875_s25  ;;  %v1277_v44 = vadd.f32 %v2980_v21, %v1241_v36 }
 0x1ba   :  { %v1028_v4 = vmul.f32 %v1824_v56, %v1027_v34  ;;  %v1037_v58 = vsub.f32 1.5, %v1036_v61  ;;  %vm799_vm11 = vweird.f32 %v3078_v45 }
 0x1bb   :  { %v958_v39 = vmul.f32 %v1826_v53, %v957_v32  ;;  %1829 = vrsqrt.f32 %v3076_v17  ;;  %1732 = vrot.lane.b32.xlu1 %v1731_v43, %s1875_s25  ;;  %v3092_v27 = vpop.xlane.xlu0 %504  ;;  %vm789_vm9 = vweird.f32 %v3076_v17 }
 0x1bc   :  { %v3088_v54 = vsel %vm1031_vm3, %v1824_v56, %v1028_v4  ;;  %v1038_v0 = vmul.f32 %v1828_v31, %v1037_v58  ;;  %1831 = vrsqrt.f32 %v3078_v45  ;;  %v606_v60 = vpop.xlane.xlu2 %605 }
 0x1bd   :  { %v3094_v30 = vsel %vm961_vm4, %v1826_v53, %v958_v39  ;;  %v603_v63 = vpop.xlane.xlu1 %602  ;;  %v678_v41 = vadd.f32 %v606_v60, %v478_v47  ;;  %v1213_v43 = vmul.f32 %v3088_v54, %v2566_v6 }
 0x1be   :  { %v3099_v50 = vsel %vm1041_vm6, %v1828_v31, %v1038_v0  ;;  %v677_v56 = vadd.f32 %v603_v63, %v3045_v48  ;;  %v1206_v12 = vmul.f32 %v3094_v30, %v2576_v28 }
 0x1bf   :  { %v710_v20 = vmul.f32 0.0078125, %v678_v41  ;;  %v1214_v53 = vmul.f32 %v3099_v50, %v2569_v2  ;;  %v1249_v3 = vmul.f32 %v2950_v33, %v1213_v43 }
 0x1c0   :  { %v709_v51 = vmul.f32 0.0078125, %v677_v56  ;;  %v1242_v47 = vmul.f32 %v2950_v33, %v1206_v12 }
 0x1c1   :  { %v1830_v59 = vpop.eup %1829  ;;  %v3109_v6 = vadd.f32 1e-05, %v710_v20  ;;  %v1250_v31 = vmul.f32 %v2950_v33, %v1214_v53  ;;  %v1285_v46 = vadd.f32 %v2980_v21, %v1249_v3 }
 0x1c2   :  { %v1832_v48 = vpop.eup %1831  ;;  %v784_v62 = vmul.f32 %v1830_v59, %v3076_v17  ;;  %v3113_v28 = vadd.f32 1e-05, %v709_v51  ;;  %v1278_v49 = vadd.f32 %v2980_v21, %v1242_v47  ;;  %vm790_vm7 = vweird.f32 %v1830_v59 }
 0x1c3   :  { %v794_v2 = vmul.f32 %v1832_v48, %v3078_v45  ;;  %1833 = vrsqrt.f32 %v3109_v6  ;;  %v3121_v34 = vpop.xlane.xlu0 %531  ;;  %v1286_v58 = vadd.f32 %v2980_v21, %v1250_v31  ;;  %vm800_vm8 = vweird.f32 %v1832_v48  ;;  %vm791_vm10 = vmor %vm789_vm9, %vm790_vm7 }
 0x1c4   :  { %v785_v8 = vmul.f32 %v1830_v59, %v784_v62  ;;  %1835 = vrsqrt.f32 %v3113_v28  ;;  %v529_v57 = vpop.xlane.xlu2 %528  ;;  %v1741_v61 = vpack.i.bf16 %v1278_v49, %v1277_v44  ;;  %vm801_vm12 = vmor %vm799_vm11, %vm800_vm8  ;;  %vm879_vm15 = vweird.f32 %v3109_v6 }
 0x1c5   :  { %v795_v32 = vmul.f32 %v1832_v48, %v794_v2  ;;  %v508_v4 = vpop.xlane.xlu1 %507  ;;  %v1746_v0 = vpack.i.bf16 %v1286_v58, %v1285_v46  ;;  %vm869_vm1 = vweird.f32 %v3113_v28 }
 0x1c6   :  { %v786_v26 = vmul.f32 0.5, %v785_v8  ;;  %1742 = vrot.lane.b32.xlu0 %v1741_v61, %s1875_s25 }
 0x1c7   :  { %v796_v39 = vmul.f32 0.5, %v795_v32  ;;  %1747 = vrot.lane.b32.xlu2 %v1746_v0, %s1875_s25 }
 0x1c8   :  { %v787_v60 = vsub.f32 1.5, %v786_v26 }
 0x1c9   :  { %v1834_v63 = vpop.eup %1833  ;;  %v797_v41 = vsub.f32 1.5, %v796_v39 }
 0x1ca   :  { %v1836_v43 = vpop.eup %1835  ;;  %v788_v56 = vmul.f32 %v1830_v59, %v787_v60  ;;  %v874_v12 = vmul.f32 %v1834_v63, %v3109_v6  ;;  %vm880_vm13 = vweird.f32 %v1834_v63 }
 0x1cb   :  { %v798_v36 = vmul.f32 %v1832_v48, %v797_v41  ;;  %v864_v20 = vmul.f32 %v1836_v43, %v3113_v28  ;;  %v657_v47 = vpop.xlane.xlu0 %656  ;;  %vm870_vm14 = vweird.f32 %v1836_v43  ;;  %vm881_vm2 = vmor %vm879_vm15, %vm880_vm13 }
 0x1cc   :  { %v3130_v53 = vsel %vm791_vm10, %v1830_v59, %v788_v56  ;;  %v875_v3 = vmul.f32 %v1834_v63, %v874_v12  ;;  %v636_v51 = vpop.xlane.xlu2 %635  ;;  %v695_v46 = vadd.f32 %v657_v47, %v529_v57  ;;  %vm871_vm3 = vmor %vm869_vm1, %vm870_vm14 }
 0x1cd   :  { %v3132_v31 = vsel %vm801_vm12, %v1832_v48, %v798_v36  ;;  %v865_v62 = vmul.f32 %v1836_v43, %v864_v20  ;;  %v688_v44 = vadd.f32 %v636_v51, %v508_v4  ;;  %v633_v49 = vpop.xlane.xlu1 %632  ;;  %v1189_v59 = vmul.f32 %v3130_v53, %v2608_v16 }
 0x1ce   :  { %v876_v17 = vmul.f32 0.5, %v875_v3  ;;  %v687_v2 = vadd.f32 %v633_v49, %v3092_v27  ;;  %v1190_v61 = vmul.f32 %v3132_v31, %v2611_v37  ;;  %v727_v58 = vmul.f32 0.0078125, %v695_v46 }
 0x1cf   :  { %v866_v8 = vmul.f32 0.5, %v865_v62  ;;  %v720_v45 = vmul.f32 0.0078125, %v688_v44  ;;  %v1225_v39 = vmul.f32 %v2950_v33, %v1189_v59 }
 0x1d0   :  { %v877_v32 = vsub.f32 1.5, %v876_v17  ;;  %v719_v48 = vmul.f32 0.0078125, %v687_v2  ;;  %v1226_v27 = vmul.f32 %v2950_v33, %v1190_v61  ;;  %v3146_v16 = vadd.f32 1e-05, %v727_v58 }
 0x1d1   :  { %v867_v26 = vsub.f32 1.5, %v866_v8  ;;  %v3139_v4 = vadd.f32 1e-05, %v720_v45  ;;  %v1261_v37 = vadd.f32 %v2980_v21, %v1225_v39 }
 0x1d2   :  { %v878_v57 = vmul.f32 %v1834_v63, %v877_v32  ;;  %v3144_v0 = vadd.f32 1e-05, %v719_v48  ;;  %v1262_v36 = vadd.f32 %v2980_v21, %v1226_v27  ;;  %vm1049_vm11 = vweird.f32 %v3146_v16 }
 0x1d3   :  { %v868_v60 = vmul.f32 %v1836_v43, %v867_v26  ;;  %1837 = vrsqrt.f32 %v3139_v4  ;;  %v3156_v56 = vpop.xlane.xlu0 %459  ;;  %vm979_vm6 = vweird.f32 %v3139_v4 }
 0x1d4   :  { %v3153_v41 = vsel %vm881_vm2, %v1834_v63, %v878_v57  ;;  %1839 = vrsqrt.f32 %v3144_v0  ;;  %v457_v6 = vpop.xlane.xlu2 %456  ;;  %v1751_v51 = vpack.i.bf16 %v1262_v36, %v1261_v37  ;;  %v1695_v36 = vld [vmem:[%s3760_s6 + $0x18] sm:$0xff]  ;;  %vm969_vm8 = vweird.f32 %v3144_v0 }
 0x1d5   :  { %v3158_v12 = vsel %vm871_vm3, %v1836_v43, %v868_v60  ;;  %1841 = vrsqrt.f32 %v3146_v16  ;;  %v660_v28 = vpop.xlane.xlu1 %659  ;;  %v1198_v63 = vmul.f32 %v3153_v41, %v2629_v42  ;;  %1697 = vmatpush.bf16.msra.mxu2 %v1695_v36  ;;  %1696 = vmatpush.bf16.msra.mxu1 %v1695_v36 }
 0x1d6   :  { %v696_v20 = vadd.f32 %v660_v28, %v3121_v34  ;;  %v1197_v3 = vmul.f32 %v3158_v12, %v2637_v19  ;;  %1752 = vrot.lane.b32.xlu1 %v1751_v51, %s1875_s25  ;;  %1698 = vmatpush.bf16.msra.mxu3 %v1695_v36 }
 0x1d7   :  { %v1234_v43 = vmul.f32 %v2950_v33, %v1198_v63  ;;  %1531 = vmatpush.bf16.msra.mxu0 %v1695_v36 }
 0x1d8   :  { %v728_v47 = vmul.f32 0.0078125, %v696_v20  ;;  %v1233_v62 = vmul.f32 %v2950_v33, %v1197_v3 }
 0x1d9   :  { %v1838_v44 = vpop.eup %1837  ;;  %v1270_v46 = vadd.f32 %v2980_v21, %v1234_v43 }
 0x1da   :  { %v1840_v49 = vpop.eup %1839  ;;  %v974_v17 = vmul.f32 %v1838_v44, %v3139_v4  ;;  %v3171_v2 = vadd.f32 1e-05, %v728_v47  ;;  %v1269_v34 = vadd.f32 %v2980_v21, %v1233_v62  ;;  %vm980_vm4 = vweird.f32 %v1838_v44 }
 0x1db   :  { %v3174_v19 = vpop.eup %1841  ;;  %v964_v42 = vmul.f32 %v1840_v49, %v3144_v0  ;;  %v585_v61 = vpop.xlane.xlu0 %584  ;;  %vm970_vm5 = vweird.f32 %v1840_v49  ;;  %vm981_vm7 = vmor %vm979_vm6, %vm980_vm4 }
 0x1dc   :  { %v975_v8 = vmul.f32 %v1838_v44, %v974_v17  ;;  %v1044_v45 = vmul.f32 %v3174_v19, %v3146_v16  ;;  %1843 = vrsqrt.f32 %v3171_v2  ;;  %v484_v59 = vpop.xlane.xlu2 %483  ;;  %v671_v58 = vadd.f32 %v585_v61, %v457_v6  ;;  %vm971_vm9 = vmor %vm969_vm8, %vm970_vm5  ;;  %v1693_v16 = vld [vmem:[%s3760_s6 + $0x8] sm:$0xff] }
 0x1dd   :  { %v965_v32 = vmul.f32 %v1840_v49, %v964_v42  ;;  %v481_v48 = vpop.xlane.xlu1 %480  ;;  %v1756_v26 = vpack.i.bf16 %v1270_v46, %v1269_v34  ;;  %vm1050_vm10 = vweird.f32 %v3174_v19  ;;  %v1694_v34 = vld [vmem:[%s3760_s6 + $0x10] sm:$0xff]  ;;  %vm1059_vm14 = vweird.f32 %v3171_v2 }
 0x1de   :  { %v976_v39 = vmul.f32 0.5, %v975_v8  ;;  %v1045_v27 = vmul.f32 %v3174_v19, %v1044_v45  ;;  %v703_v60 = vmul.f32 0.0078125, %v671_v58  ;;  %1700 = vmatpush.bf16.msra.mxu2 %v1694_v34  ;;  %1699 = vmatpush.bf16.msra.mxu1 %v1694_v34  ;;  %vm1051_vm12 = vmor %vm1049_vm11, %vm1050_vm10 }
 0x1df   :  { %v966_v57 = vmul.f32 0.5, %v965_v32  ;;  %1757 = vrot.lane.b32.xlu0 %v1756_v26, %s1875_s25  ;;  %1701 = vmatpush.bf16.msra.mxu3 %v1694_v34 }
 0x1e0   :  { %v977_v37 = vsub.f32 1.5, %v976_v39  ;;  %v1046_v28 = vmul.f32 0.5, %v1045_v27  ;;  %v3186_v3 = vadd.f32 1e-05, %v703_v60  ;;  %1532 = vmatpush.bf16.msra.mxu0 %v1694_v34 }
 0x1e1   :  { %v967_v20 = vsub.f32 1.5, %v966_v57 }
 0x1e2   :  { %v3188_v6 = vpop.eup %1843  ;;  %v978_v63 = vmul.f32 %v1838_v44, %v977_v37  ;;  %v1047_v51 = vsub.f32 1.5, %v1046_v28  ;;  %1845 = vrsqrt.f32 %v3186_v3  ;;  %1703 = vmatpush.bf16.msra.mxu2 %v1693_v16  ;;  %1702 = vmatpush.bf16.msra.mxu1 %v1693_v16  ;;  %vm809_vm2 = vweird.f32 %v3186_v3 }
 0x1e3   :  { %v968_v47 = vmul.f32 %v1840_v49, %v967_v20  ;;  %v1054_v62 = vmul.f32 %v3188_v6, %v3171_v2  ;;  %v612_v17 = vpop.xlane.xlu0 %611  ;;  %vm1060_vm13 = vweird.f32 %v3188_v6  ;;  %1704 = vmatpush.bf16.msra.mxu3 %v1693_v16  ;;  %v1692_v2 = vld [vmem:[%s3760_s6] sm:$0xff] }
 0x1e4   :  { %v3195_v43 = vsel %vm981_vm7, %v1838_v44, %v978_v63  ;;  %v609_v4 = vpop.xlane.xlu2 %608  ;;  %v1048_v42 = vmul.f32 %v3174_v19, %v1047_v51  ;;  %v680_v61 = vadd.f32 %v612_v17, %v484_v59  ;;  %vm1061_vm15 = vmor %vm1059_vm14, %vm1060_vm13  ;;  %1533 = vmatpush.bf16.msra.mxu0 %v1693_v16 }
 0x1e5   :  { %v3202_v0 = vsel %vm971_vm9, %v1840_v49, %v968_v47  ;;  %v1055_v46 = vmul.f32 %v3188_v6, %v1054_v62  ;;  %v679_v8 = vadd.f32 %v609_v4, %v481_v48  ;;  %v588_v45 = vpop.xlane.xlu1 %587 }
 0x1e6   :  { %v672_v44 = vadd.f32 %v588_v45, %v3156_v56  ;;  %v1207_v26 = vmul.f32 %v3202_v0, %v2678_v22  ;;  %v712_v48 = vmul.f32 0.0078125, %v680_v61  ;;  %v1208_v56 = vmul.f32 %v3195_v43, %v2673_v38  ;;  %1706 = vmatpush.bf16.msra.mxu2 %v1692_v2  ;;  %1705 = vmatpush.bf16.msra.mxu1 %v1692_v2  ;;  %v1691_v45 = vld [vmem:[%s3761_s5 + $0x18] sm:$0xff] }
 0x1e7   :  { %v1056_v32 = vmul.f32 0.5, %v1055_v46  ;;  %v711_v58 = vmul.f32 0.0078125, %v679_v8  ;;  %v3221_v22 = vsel %vm1051_vm12, %v3174_v19, %v1048_v42  ;;  %1707 = vmatpush.bf16.msra.mxu3 %v1692_v2 }
 0x1e8   :  { %v704_v49 = vmul.f32 0.0078125, %v672_v44  ;;  %v3218_v59 = vpop.eup %1845  ;;  %v1243_v57 = vmul.f32 %v2950_v33, %v1207_v26  ;;  %v3230_v38 = vadd.f32 1e-05, %v712_v48  ;;  %v1244_v19 = vmul.f32 %v2950_v33, %v1208_v56  ;;  %1534 = vmatpush.bf16.msra.mxu0 %v1692_v2 }
 0x1e9   :  { %v1057_v39 = vsub.f32 1.5, %v1056_v32  ;;  %v3223_v27 = vadd.f32 1e-05, %v711_v58  ;;  %v804_v60 = vmul.f32 %v3218_v59, %v3186_v3  ;;  %v1215_v51 = vmul.f32 %v3221_v22, %v2670_v1 }
 0x1ea   :  { %v3228_v37 = vadd.f32 1e-05, %v704_v49  ;;  %v1279_v4 = vadd.f32 %v2980_v21, %v1243_v57  ;;  %v1280_v17 = vadd.f32 %v2980_v21, %v1244_v19  ;;  %1709 = vmatpush.bf16.msra.mxu2 %v1691_v45  ;;  %vm810_vm1 = vweird.f32 %v3218_v59  ;;  %1708 = vmatpush.bf16.msra.mxu1 %v1691_v45 }
 0x1eb   :  { %v1058_v28 = vmul.f32 %v3188_v6, %v1057_v39  ;;  %1847 = vrsqrt.f32 %v3223_v27  ;;  %v805_v36 = vmul.f32 %v3218_v59, %v804_v60  ;;  %v3240_v63 = vpop.xlane.xlu0 %534  ;;  %v1251_v8 = vmul.f32 %v2950_v33, %v1215_v51  ;;  %1710 = vmatpush.bf16.msra.mxu3 %v1691_v45  ;;  %v1690_v60 = vld [vmem:[%s3761_s5 + $0x10] sm:$0xff]  ;;  %vm811_vm3 = vmor %vm809_vm2, %vm810_vm1 }
 0x1ec   :  { %1849 = vrsqrt.f32 %v3228_v37  ;;  %v514_v20 = vpop.xlane.xlu2 %513  ;;  %v1761_v1 = vpack.i.bf16 %v1280_v17, %v1279_v4  ;;  %1535 = vmatpush.bf16.msra.mxu0 %v1691_v45  ;;  %vm889_vm4 = vweird.f32 %v3223_v27  ;;  %vm819_vm9 = vweird.f32 %v3228_v37 }
 0x1ed   :  { %v3248_v47 = vsel %vm1061_vm15, %v3188_v6, %v1058_v28  ;;  %1851 = vrsqrt.f32 %v3230_v38  ;;  %v511_v62 = vpop.xlane.xlu1 %510  ;;  %v806_v34 = vmul.f32 0.5, %v805_v36  ;;  %v1287_v57 = vadd.f32 %v2980_v21, %v1251_v8 }
 0x1ee   :  { %v1216_v42 = vmul.f32 %v3248_v47, %v2700_v29  ;;  %1762 = vrot.lane.b32.xlu2 %v1761_v1, %s1875_s25  ;;  %1712 = vmatpush.bf16.msra.mxu2 %v1690_v60  ;;  %vm899_vm11 = vweird.f32 %v3230_v38 }
 0x1ef   :  { %v807_v46 = vsub.f32 1.5, %v806_v34  ;;  %1711 = vmatpush.bf16.msra.mxu1 %v1690_v60  ;;  %1713 = vmatpush.bf16.msra.mxu3 %v1690_v60 }
 0x1f0   :  { %v1252_v6 = vmul.f32 %v2950_v33, %v1216_v42  ;;  %1536 = vmatpush.bf16.msra.mxu0 %v1690_v60 }
 0x1f1   :  { %v1848_v44 = vpop.eup %1847  ;;  %v808_v26 = vmul.f32 %v3218_v59, %v807_v46 }
 0x1f2   :  { %v3261_v61 = vpop.eup %1849  ;;  %v884_v29 = vmul.f32 %v1848_v44, %v3223_v27  ;;  %v1288_v32 = vadd.f32 %v2980_v21, %v1252_v6  ;;  %vm890_vm5 = vweird.f32 %v1848_v44 }
 0x1f3   :  { %v3265_v58 = vpop.eup %1851  ;;  %v814_v49 = vmul.f32 %v3261_v61, %v3228_v37  ;;  %v642_v39 = vpop.xlane.xlu0 %641  ;;  %v3283_v34 = vsel %vm811_vm3, %v3218_v59, %v808_v26  ;;  %vm820_vm6 = vweird.f32 %v3261_v61  ;;  %vm891_vm8 = vmor %vm889_vm4, %vm890_vm5  ;;  %v1688_v37 = vld [vmem:[%s3761_s5] sm:$0xff] }
 0x1f4   :  { %v885_v48 = vmul.f32 %v1848_v44, %v884_v29  ;;  %v894_v56 = vmul.f32 %v3265_v58, %v3230_v38  ;;  %v639_v16 = vpop.xlane.xlu2 %638  ;;  %v690_v51 = vadd.f32 %v642_v39, %v514_v20  ;;  %v1766_v17 = vpack.i.bf16 %v1288_v32, %v1287_v57  ;;  %vm821_vm10 = vmor %vm819_vm9, %vm820_vm6 }
 0x1f5   :  { %v815_v28 = vmul.f32 %v3261_v61, %v814_v49  ;;  %v689_v19 = vadd.f32 %v639_v16, %v511_v62  ;;  %v538_v36 = vpop.xlane.xlu1 %537  ;;  %v1689_v62 = vld [vmem:[%s3761_s5 + $0x8] sm:$0xff]  ;;  %vm900_vm7 = vweird.f32 %v3265_v58  ;;  %v1191_v32 = vmul.f32 %v3283_v34, %v2710_v35 }
 0x1f6   :  { %v886_v2 = vmul.f32 0.5, %v885_v48  ;;  %v895_v4 = vmul.f32 %v3265_v58, %v894_v56  ;;  %v722_v46 = vmul.f32 0.0078125, %v690_v51  ;;  %1767 = vrot.lane.b32.xlu1 %v1766_v17, %s1875_s25  ;;  %1715 = vmatpush.bf16.msra.mxu2 %v1689_v62  ;;  %vm901_vm12 = vmor %vm899_vm11, %vm900_vm7 }
 0x1f7   :  { %v816_v42 = vmul.f32 0.5, %v815_v28  ;;  %v721_v1 = vmul.f32 0.0078125, %v689_v19  ;;  %1714 = vmatpush.bf16.msra.mxu1 %v1689_v62  ;;  %1716 = vmatpush.bf16.msra.mxu3 %v1689_v62  ;;  %v1227_v28 = vmul.f32 %v2950_v33, %v1191_v32 }
 0x1f8   :  { %v887_v3 = vsub.f32 1.5, %v886_v2  ;;  %v896_v20 = vmul.f32 0.5, %v895_v4  ;;  %v3293_v6 = vadd.f32 1e-05, %v722_v46  ;;  %1537 = vmatpush.bf16.msra.mxu0 %v1689_v62 }
 0x1f9   :  { %v817_v8 = vsub.f32 1.5, %v816_v42  ;;  %v3291_v59 = vadd.f32 1e-05, %v721_v1  ;;  %v1263_v1 = vadd.f32 %v2980_v21, %v1227_v28 }
 0x1fa   :  { %v888_v45 = vmul.f32 %v1848_v44, %v887_v3  ;;  %v897_v29 = vsub.f32 1.5, %v896_v20  ;;  %1718 = vmatpush.bf16.msra.mxu2 %v1688_v37  ;;  %v3346_v3 = vld [vmem:[%s3758_s1] ss:$0 sm:$0xff]  ;;  %v3979_v20 = vld [vmem:[#allocation56_spill] sm:$0xff]  ;;  %vm999_vm2 = vweird.f32 %v3293_v6 }
 0x1fb   :  { %v818_v26 = vmul.f32 %v3261_v61, %v817_v8  ;;  %1853 = vrsqrt.f32 %v3291_v59  ;;  %v3310_v27 = vpop.xlane.xlu0 %462  ;;  %1717 = vmatpush.bf16.msra.mxu1 %v1688_v37  ;;  %1719 = vmatpush.bf16.msra.mxu3 %v1688_v37  ;;  %vm989_vm15 = vweird.f32 %v3291_v59 }
 0x1fc   :  { %v3303_v49 = vsel %vm891_vm8, %v1848_v44, %v888_v45  ;;  %v898_v48 = vmul.f32 %v3265_v58, %v897_v29  ;;  %1855 = vrsqrt.f32 %v3293_v6  ;;  %v666_v35 = vpop.xlane.xlu2 %665  ;;  %1538 = vmatpush.bf16.msra.mxu0 %v1688_v37 }
 0x1fd   :  { %v3316_v44 = vsel %vm821_vm10, %v3261_v61, %v818_v26  ;;  %v698_v56 = vadd.f32 %v666_v35, %v538_v36  ;;  %v663_v16 = vpop.xlane.xlu1 %662  ;;  %v1199_v38 = vmul.f32 %v3303_v49, %v2728_v24 }
 0x1fe   :  { %v3323_v39 = vsel %vm901_vm12, %v3265_v58, %v898_v48  ;;  %v697_v57 = vadd.f32 %v663_v16, %v3240_v63  ;;  %v1192_v60 = vmul.f32 %v3316_v44, %v2738_v14  ;;  %v3978_v63 = vld [vmem:[#allocation58_spill] sm:$0xff] }
 0x1ff   :  { %v730_v61 = vmul.f32 0.0078125, %v698_v56  ;;  %v1200_v19 = vmul.f32 %v3323_v39, %v2732_v13  ;;  %v1235_v36 = vmul.f32 %v2950_v33, %v1199_v38  ;;  %v1099_v2 = vmul.f32 %v2924_v23, %v3978_v63  ;;  %v3362_v56 = vld [vmem:[%s3759_s3] ss:$0 sm:$0xff] }
 0x200   :  { %v729_v24 = vmul.f32 0.0078125, %v697_v57  ;;  %v1228_v58 = vmul.f32 %v2950_v33, %v1192_v60  ;;  %v1100_v23 = vmul.f32 %v2957_v7, %v3979_v20  ;;  %v3980_v60 = vld [vmem:[#allocation59_spill] sm:$0xff] }
 0x201   :  { %v1854_v51 = vpop.eup %1853  ;;  %v3335_v14 = vadd.f32 1e-05, %v730_v61  ;;  %v1236_v4 = vmul.f32 %v2950_v33, %v1200_v19  ;;  %v1271_v33 = vadd.f32 %v2980_v21, %v1235_v36  ;;  %v1135_v7 = vmul.f32 %v3346_v3, %v1099_v2  ;;  %v3981_v61 = vld [vmem:[#allocation57_spill] sm:$0xff] }
 0x202   :  { %v1856_v17 = vpop.eup %1855  ;;  %v984_v42 = vmul.f32 %v1854_v51, %v3291_v59  ;;  %v3339_v13 = vadd.f32 1e-05, %v729_v24  ;;  %v1264_v46 = vadd.f32 %v2980_v21, %v1228_v58  ;;  %v1136_v57 = vmul.f32 %v3346_v3, %v1100_v23 }
 0x203   :  { %v994_v62 = vmul.f32 %v1856_v17, %v3293_v6  ;;  %1857 = vrsqrt.f32 %v3335_v14  ;;  %v3354_v29 = vpop.xlane.xlu0 %489  ;;  %v1272_v35 = vadd.f32 %v2980_v21, %v1236_v4  ;;  %v1108_v28 = vmul.f32 %v2960_v40, %v3980_v60 }
 0x204   :  { %v985_v8 = vmul.f32 %v1854_v51, %v984_v42  ;;  %1859 = vrsqrt.f32 %v3339_v13  ;;  %v487_v45 = vpop.xlane.xlu2 %486  ;;  %v1771_v32 = vpack.i.bf16 %v1264_v46, %v1263_v1  ;;  %v1107_v21 = vmul.f32 %v2967_v9, %v3981_v61 }
 0x205   :  { %v995_v26 = vmul.f32 %v1856_v17, %v994_v62  ;;  %v466_v48 = vpop.xlane.xlu1 %465  ;;  %v1776_v38 = vpack.i.bf16 %v1272_v35, %v1271_v33  ;;  %vm990_vm13 = vweird.f32 %v1854_v51  ;;  %vm1000_vm14 = vweird.f32 %v1856_v17  ;;  %v3982_v33 = vld [vmem:[#allocation61_spill] sm:$0xff] }
 0x206   :  { %v986_v37 = vmul.f32 0.5, %v985_v8  ;;  %1772 = vrot.lane.b32.xlu0 %v1771_v32, %s1875_s25  ;;  %v3373_v4 = vadd.f32 %v3362_v56, %v1135_v7  ;;  %vm991_vm1 = vmor %vm989_vm15, %vm990_vm13  ;;  %v1172_v42 = vadd.f32 %v3362_v56, %v1136_v57  ;;  %v1143_v59 = vmul.f32 %v3346_v3, %v1107_v21  ;;  %v3983_v57 = vld [vmem:[#allocation27_spill] sm:$0xff] }
 0x207   :  { %v996_v16 = vmul.f32 0.5, %v995_v26  ;;  %1777 = vrot.lane.b32.xlu2 %v1776_v38, %s1875_s25  ;;  %vm1001_vm3 = vmor %vm999_vm2, %vm1000_vm14  ;;  %v1144_v62 = vmul.f32 %v3346_v3, %v1108_v28  ;;  %v1091_v8 = vmul.f32 %v3034_v18, %v3982_v33  ;;  %vm1079_vm4 = vweird.f32 %v3335_v14  ;;  %v3984_v28 = vld [vmem:[#allocation10_spill] sm:$0xff] }
 0x208   :  { %v987_v19 = vsub.f32 1.5, %v986_v37  ;;  %vm1069_vm8 = vweird.f32 %v3339_v13 }
 0x209   :  { %v1858_v36 = vpop.eup %1857  ;;  %v997_v24 = vsub.f32 1.5, %v996_v16 }
 0x20a   :  { %v1860_v58 = vpop.eup %1859  ;;  %v988_v63 = vmul.f32 %v1854_v51, %v987_v19  ;;  %v1074_v2 = vmul.f32 %v1858_v36, %v3335_v14  ;;  %vm1080_vm5 = vweird.f32 %v1858_v36  ;;  %v3421_v14 = vadd.f32 %v3362_v56, %v1144_v62 }
 0x20b   :  { %v998_v40 = vmul.f32 %v1856_v17, %v997_v24  ;;  %v1064_v9 = vmul.f32 %v1860_v58, %v3339_v13  ;;  %v615_v23 = vpop.xlane.xlu0 %614  ;;  %vm1070_vm6 = vweird.f32 %v1860_v58  ;;  %vm1081_vm7 = vmor %vm1079_vm4, %vm1080_vm5 }
 0x20c   :  { %v3378_v1 = vsel %vm991_vm1, %v1854_v51, %v988_v63  ;;  %v1075_v46 = vmul.f32 %v1858_v36, %v1074_v2  ;;  %v594_v20 = vpop.xlane.xlu2 %593  ;;  %v681_v7 = vadd.f32 %v615_v23, %v487_v45  ;;  %vm1071_vm9 = vmor %vm1069_vm8, %vm1070_vm6 }
 0x20d   :  { %v3384_v32 = vsel %vm1001_vm3, %v1856_v17, %v998_v40  ;;  %v1065_v6 = vmul.f32 %v1860_v58, %v1064_v9  ;;  %v674_v26 = vadd.f32 %v594_v20, %v466_v48  ;;  %v591_v35 = vpop.xlane.xlu1 %590  ;;  %v1209_v60 = vmul.f32 %v3378_v1, %v3983_v57  ;;  %v3985_v9 = vld [vmem:[#allocation62_spill] sm:$0xff]  ;;  %v3986_v57 = vld [vmem:[#allocation32_spill] sm:$0xff] }
 0x20e   :  { %v1076_v37 = vmul.f32 0.5, %v1075_v46  ;;  %v673_v51 = vadd.f32 %v591_v35, %v3310_v27  ;;  %v1210_v61 = vmul.f32 %v3384_v32, %v3984_v28  ;;  %v713_v21 = vmul.f32 0.0078125, %v681_v7  ;;  %v3397_v27 = vld [vmem:[%s3756_s2] ss:$0 sm:$0xff] }
 0x20f   :  { %v1066_v16 = vmul.f32 0.5, %v1065_v6  ;;  %v706_v38 = vmul.f32 0.0078125, %v674_v26  ;;  %v1245_v45 = vmul.f32 %v3397_v27, %v1209_v60  ;;  %v1092_v46 = vmul.f32 %v3051_v25, %v3985_v9  ;;  %v3417_v6 = vld [vmem:[%s3757_s4] ss:$0 sm:$0xff]  ;;  %v3990_v9 = vld [vmem:[#allocation60_spill] sm:$0xff] }
 0x210   :  { %v1077_v18 = vsub.f32 1.5, %v1076_v37  ;;  %v705_v17 = vmul.f32 0.0078125, %v673_v51  ;;  %v3402_v2 = vadd.f32 1e-05, %v713_v21  ;;  %v1246_v40 = vmul.f32 %v3397_v27, %v1210_v61  ;;  %v3988_v61 = vld [vmem:[#allocation67_spill] sm:$0xff] }
 0x211   :  { %v1067_v48 = vsub.f32 1.5, %v1066_v16  ;;  %v3392_v19 = vadd.f32 1e-05, %v706_v38  ;;  %v1281_v25 = vadd.f32 %v3417_v6, %v1245_v45  ;;  %v1179_v35 = vadd.f32 %v3362_v56, %v1143_v59 }
 0x212   :  { %v1078_v24 = vmul.f32 %v1858_v36, %v1077_v18  ;;  %v3400_v63 = vadd.f32 1e-05, %v705_v17  ;;  %v1282_v7 = vadd.f32 %v3417_v6, %v1246_v40  ;;  %v1127_v16 = vmul.f32 %v3346_v3, %v1091_v8  ;;  %v3989_v8 = vld [vmem:[#allocation66_spill] sm:$0xff] }
 0x213   :  { %v1068_v20 = vmul.f32 %v1860_v58, %v1067_v48  ;;  %1861 = vrsqrt.f32 %v3392_v19  ;;  %v1128_v28 = vmul.f32 %v3346_v3, %v1092_v46  ;;  %v1109_v59 = vmul.f32 %v3088_v54, %v3988_v61 }
 0x214   :  { %v3411_v23 = vsel %vm1081_vm7, %v1858_v36, %v1078_v24  ;;  %1863 = vrsqrt.f32 %v3400_v63  ;;  %v1723_v33 = vpop.permute.xlu2 %1722  ;;  %v3446_v46 = vmul.f32 %v3025_v10, %v3990_v9  ;;  %vm839_vm10 = vweird.f32 %v3392_v19 }
 0x215   :  { %v3423_v26 = vsel %vm1071_vm9, %v1860_v58, %v1068_v20  ;;  %1865 = vrsqrt.f32 %v3402_v2  ;;  %v618_v13 = vpop.xlane.xlu1 %617  ;;  %v1725_v36 = vunpack.i.h.bf16 %v1723_v33  ;;  %v1724_v51 = vunpack.i.l.bf16 %v1723_v33  ;;  %v3987_v58 = vld [vmem:[#allocation53_spill] sm:$0xff] }
 0x216   :  { %v682_v37 = vadd.f32 %v618_v13, %v3354_v29  ;;  %v1217_v62 = vmul.f32 %v3423_v26, %v3986_v57  ;;  %v1218_v60 = vmul.f32 %v3411_v23, %v3987_v58  ;;  %v1781_v29 = vpack.i.bf16 %v1282_v7, %v1281_v25 }
 0x217   :  { %v1436_v38 = vsel %vm90_vm0, %v1172_v42, %v1725_v36  ;;  %v1435_v17 = vsel %vm90_vm0, %v3373_v4, %v1724_v51  ;;  %v1110_v42 = vmul.f32 %v3099_v50, %v3989_v8  ;;  %v1163_v4 = vadd.f32 %v3362_v56, %v1127_v16 }
 0x218   :  { %v714_v18 = vmul.f32 0.0078125, %v682_v37  ;;  %v1459_v48 = vpack.c.bf16 %v1436_v38, %v1435_v17  ;;  %v1253_v45 = vmul.f32 %v3397_v27, %v1217_v62  ;;  %v1254_v24 = vmul.f32 %v3397_v27, %v1218_v60  ;;  %1782 = vrot.lane.b32.xlu1 %v1781_v29, %s1875_s25 }
 0x219   :  { %v1862_v21 = vpop.eup %1861  ;;  %v1164_v36 = vadd.f32 %v3362_v56, %v1128_v28  ;;  %v1145_v7 = vmul.f32 %v3346_v3, %v1109_v59  ;;  %v1146_v62 = vmul.f32 %v3346_v3, %v1110_v42  ;;  %vm829_vm12 = vweird.f32 %v3400_v63 }
 0x21a   :  { %v1864_v40 = vpop.eup %1863  ;;  %v834_v54 = vmul.f32 %v1862_v21, %v3392_v19  ;;  %v3449_v20 = vadd.f32 1e-05, %v714_v18  ;;  %1579 = vmatmul.bf16.vlgmr.msra.gmra.mxu2 %v1459_v48  ;;  %v1289_v25 = vadd.f32 %v3417_v6, %v1253_v45  ;;  %v1290_v13 = vadd.f32 %v3417_v6, %v1254_v24 }
 0x21b   :  { %v1866_v33 = vpop.eup %1865  ;;  %v824_v50 = vmul.f32 %v1864_v40, %v3400_v63  ;;  %vm840_vm11 = vweird.f32 %v1862_v21  ;;  %vm830_vm13 = vweird.f32 %v1864_v40  ;;  %vm909_vm2 = vweird.f32 %v3402_v2 }
 0x21c   :  { %v835_v10 = vmul.f32 %v1862_v21, %v834_v54  ;;  %v904_v37 = vmul.f32 %v1866_v33, %v3402_v2  ;;  %1867 = vrsqrt.f32 %v3449_v20  ;;  %v1738_v51 = vpop.permute.xlu2 %1737  ;;  %v1786_v61 = vpack.i.bf16 %v1290_v13, %v1289_v25  ;;  %vm841_vm14 = vmor %vm839_vm10, %vm840_vm11 }
 0x21d   :  { %v825_v38 = vmul.f32 %v1864_v40, %v824_v50  ;;  %v1740_v16 = vunpack.i.h.bf16 %v1738_v51  ;;  %v1739_v57 = vunpack.i.l.bf16 %v1738_v51  ;;  %vm910_vm15 = vweird.f32 %v1866_v33  ;;  %vm831_vm1 = vmor %vm829_vm12, %vm830_vm13 }
 0x21e   :  { %v836_v58 = vmul.f32 0.5, %v835_v10  ;;  %v905_v60 = vmul.f32 %v1866_v33, %v904_v37  ;;  %v1728_v18 = vpop.permute.xlu0 %1727  ;;  %1787 = vrot.lane.b32.xlu0 %v1786_v61, %s1875_s25  ;;  %v3991_v37 = vld [vmem:[#allocation63_spill] sm:$0xff]  ;;  %vm911_vm3 = vmor %vm909_vm2, %vm910_vm15  ;;  %v1119_v2 = vmul.f32 %v3346_v3, %v3446_v46  ;;  %vm919_vm5 = vweird.f32 %v3449_v20 }
 0x21f   :  { %v826_v28 = vmul.f32 0.5, %v825_v38  ;;  %v1427_v29 = vsel %vm90_vm0, %v1163_v4, %v1739_v57  ;;  %v1428_v17 = vsel %vm90_vm0, %v1164_v36, %v1740_v16  ;;  %v1730_v59 = vunpack.i.h.bf16 %v1728_v18 }
 0x220   :  { %v837_v8 = vsub.f32 1.5, %v836_v58  ;;  %v906_v48 = vmul.f32 0.5, %v905_v60  ;;  %v1729_v45 = vunpack.i.l.bf16 %v1728_v18  ;;  %v1455_v42 = vpack.c.bf16 %v1428_v17, %v1427_v29 }
 0x221   :  { %v827_v24 = vsub.f32 1.5, %v826_v28  ;;  %v1444_v4 = vsel %vm90_vm0, %v3421_v14, %v1730_v59  ;;  %v1084_v51 = vmul.f32 %v3022_v52, %v3991_v37  ;;  %v1182_v60 = vadd.f32 %v3362_v56, %v1146_v62  ;;  %v3994_v37 = vld [vmem:[#allocation64_spill] sm:$0xff] }
 0x222   :  { %v1868_v9 = vpop.eup %1867  ;;  %v838_v54 = vmul.f32 %v1862_v21, %v837_v8  ;;  %v907_v50 = vsub.f32 1.5, %v906_v48  ;;  %v1443_v25 = vsel %vm90_vm0, %v1179_v35, %v1729_v45  ;;  %1559 = vmatmul.bf16.vlgmr.msra.gmra.mxu1 %v1455_v42 }
 0x223   :  { %v828_v13 = vmul.f32 %v1864_v40, %v827_v24  ;;  %v914_v36 = vmul.f32 %v1868_v9, %v3449_v20  ;;  %v1463_v10 = vpack.c.bf16 %v1444_v4, %v1443_v25  ;;  %v1120_v18 = vmul.f32 %v3346_v3, %v1084_v51  ;;  %v3992_v25 = vld [vmem:[#allocation2_spill] sm:$0xff] }
 0x224   :  { %v3475_v38 = vsel %vm841_vm14, %v1862_v21, %v838_v54  ;;  %v908_v14 = vmul.f32 %v1866_v33, %v907_v50  ;;  %v1748_v35 = vpop.permute.xlu2 %1747  ;;  %v1181_v21 = vadd.f32 %v3362_v56, %v1145_v7  ;;  %vm920_vm4 = vweird.f32 %v1868_v9 }
 0x225   :  { %v3480_v16 = vsel %vm831_vm1, %v1864_v40, %v828_v13  ;;  %v915_v19 = vmul.f32 %v1868_v9, %v914_v36  ;;  %v1750_v57 = vunpack.i.h.bf16 %v1748_v35  ;;  %1599 = vmatmul.bf16.vlgmr.msra.gmra.mxu3 %v1463_v10  ;;  %v1749_v58 = vunpack.i.l.bf16 %v1748_v35  ;;  %vm921_vm6 = vmor %vm919_vm5, %vm920_vm4  ;;  %v3993_v36 = vld [vmem:[#allocation65_spill] sm:$0xff] }
 0x226   :  { %v1193_v52 = vmul.f32 %v3480_v16, %v2894_v55  ;;  %v3487_v63 = vsel %vm911_vm3, %v1866_v33, %v908_v14  ;;  %v1194_v40 = vmul.f32 %v3475_v38, %v2881_v11  ;;  %v1155_v24 = vadd.f32 %v3362_v56, %v1119_v2  ;;  %v3995_v2 = vld [vmem:[#allocation70_spill] sm:$0xff] }
 0x227   :  { %v916_v61 = vmul.f32 0.5, %v915_v19  ;;  %v1445_v29 = vsel %vm90_vm0, %v1181_v21, %v1749_v58  ;;  %v1446_v55 = vsel %vm90_vm0, %v1182_v60, %v1750_v57  ;;  %v1201_v11 = vmul.f32 %v3487_v63, %v2887_v15 }
 0x228   :  { %v1229_v28 = vmul.f32 %v3397_v27, %v1193_v52  ;;  %v1230_v33 = vmul.f32 %v3397_v27, %v1194_v40  ;;  %v1464_v62 = vpack.c.bf16 %v1446_v55, %v1445_v29  ;;  %v1156_v42 = vadd.f32 %v3362_v56, %v1120_v18  ;;  %v3996_v18 = vld [vmem:[#allocation68_spill] sm:$0xff]  ;;  %v3997_v55 = vld [vmem:[#allocation21_spill] sm:$0xff] }
 0x229   :  { %v917_v7 = vsub.f32 1.5, %v916_v61  ;;  %v1237_v15 = vmul.f32 %v3397_v27, %v1201_v11  ;;  %v1101_v10 = vmul.f32 %v3073_v5, %v3993_v36  ;;  %v1102_v51 = vmul.f32 %v3094_v30, %v3994_v37 }
 0x22a   :  { %v1265_v17 = vadd.f32 %v3417_v6, %v1229_v28  ;;  %v1266_v46 = vadd.f32 %v3417_v6, %v1230_v33  ;;  %v1085_v28 = vmul.f32 %v3130_v53, %v3995_v2  ;;  %v1086_v29 = vmul.f32 %v3132_v31, %v3996_v18  ;;  %v3998_v33 = vld [vmem:[#allocation16_spill] sm:$0xff]  ;;  %v4003_v2 = vld [vmem:[#allocation42_spill] sm:$0xff] }
 0x22b   :  { %v918_v8 = vmul.f32 %v1868_v9, %v917_v7  ;;  %v1273_v35 = vadd.f32 %v3417_v6, %v1237_v15  ;;  %v1137_v58 = vmul.f32 %v3346_v3, %v1101_v10  ;;  %v1138_v52 = vmul.f32 %v3346_v3, %v1102_v51  ;;  %v4004_v18 = vld [vmem:[#allocation4_spill] sm:$0xff] }
 0x22c   :  { %v1791_v45 = vpack.i.bf16 %v1266_v46, %v1265_v17  ;;  %v1104_v7 = vmul.f32 %v3195_v43, %v3997_v55  ;;  %v1121_v17 = vmul.f32 %v3346_v3, %v1085_v28  ;;  %v1122_v11 = vmul.f32 %v3346_v3, %v1086_v29 }
 0x22d   :  { %v3503_v48 = vsel %vm921_vm6, %v1868_v9, %v918_v8  ;;  %v1733_v59 = vpop.permute.xlu1 %1732  ;;  %v1173_v60 = vadd.f32 %v3362_v56, %v1137_v58  ;;  %v1174_v30 = vadd.f32 %v3362_v56, %v1138_v52  ;;  %v1111_v28 = vmul.f32 %v3221_v22, %v4003_v2 }
 0x22e   :  { %v1735_v54 = vunpack.i.h.bf16 %v1733_v59  ;;  %v1734_v50 = vunpack.i.l.bf16 %v1733_v59  ;;  %v1202_v4 = vmul.f32 %v3503_v48, %v3992_v25  ;;  %1792 = vrot.lane.b32.xlu2 %v1791_v45, %s1875_s25  ;;  %v1140_v46 = vmul.f32 %v3346_v3, %v1104_v7  ;;  %v3999_v59 = vld [vmem:[#allocation69_spill] sm:$0xff]  ;;  %v4000_v45 = vld [vmem:[#allocation15_spill] sm:$0xff] }
 0x22f   :  { %v1093_v53 = vmul.f32 %v3158_v12, %v3999_v59  ;;  %v1094_v31 = vmul.f32 %v3153_v41, %v4000_v45  ;;  %v1157_v43 = vadd.f32 %v3362_v56, %v1121_v17  ;;  %v1112_v29 = vmul.f32 %v3248_v47, %v4004_v18 }
 0x230   :  { %v1419_v20 = vsel %vm90_vm0, %v1155_v24, %v1734_v50  ;;  %v1420_v9 = vsel %vm90_vm0, %v1156_v42, %v1735_v54  ;;  %v1238_v13 = vmul.f32 %v3397_v27, %v1202_v4  ;;  %v1176_v50 = vadd.f32 %v3362_v56, %v1140_v46 }
 0x231   :  { %v1451_v14 = vpack.c.bf16 %v1420_v9, %v1419_v20  ;;  %v1129_v9 = vmul.f32 %v3346_v3, %v1093_v53  ;;  %v1130_v12 = vmul.f32 %v3346_v3, %v1094_v31  ;;  %v1148_v46 = vmul.f32 %v3346_v3, %v1112_v29 }
 0x232   :  { %v1274_v19 = vadd.f32 %v3417_v6, %v1238_v13 }
 0x233   :  { %1539 = vmatmul.bf16.vlgmr.msra.gmra.mxu0 %v1451_v14  ;;  %v1166_v58 = vadd.f32 %v3362_v56, %v1130_v12  ;;  %v1184_v45 = vadd.f32 %v3362_v56, %v1148_v46 }
 0x234   :  { %v1796_v57 = vpack.i.bf16 %v1274_v19, %v1273_v35 }
 0x235   :  { %1604 = vmatmul.bf16.gmra.mxu3 %v1464_v62  ;;  %v1103_v62 = vmul.f32 %v3202_v0, %v3998_v33  ;;  %v1158_v0 = vadd.f32 %v3362_v56, %v1122_v11 }
 0x236   :  { %1797 = vrot.lane.b32.xlu1 %v1796_v57, %s1875_s25  ;;  %v1165_v57 = vadd.f32 %v3362_v56, %v1129_v9 }
 0x237   :  { %v1139_v8 = vmul.f32 %v3346_v3, %v1103_v62 }
 0x238   :  { %v1743_v27 = vpop.permute.xlu0 %1742 }
 0x239   :  { %v1745_v21 = vunpack.i.h.bf16 %v1743_v27  ;;  %v1744_v5 = vunpack.i.l.bf16 %v1743_v27  ;;  %v1175_v54 = vadd.f32 %v3362_v56, %v1139_v8  ;;  %v1147_v8 = vmul.f32 %v3346_v3, %v1111_v28 }
 0x23b   :  { %v1437_v61 = vsel %vm90_vm0, %v1173_v60, %v1744_v5  ;;  %v1438_v6 = vsel %vm90_vm0, %v1174_v30, %v1745_v21  ;;  %v4001_v5 = vld [vmem:[#allocation23_spill] sm:$0xff]  ;;  %v1183_v53 = vadd.f32 %v3362_v56, %v1147_v8 }
 0x23c   :  { %v1460_v40 = vpack.c.bf16 %v1438_v6, %v1437_v61  ;;  %v1095_v60 = vmul.f32 %v3303_v49, %v4001_v5  ;;  %v4002_v30 = vld [vmem:[#allocation47_spill] sm:$0xff] }
 0x23d   :  { %v1096_v61 = vmul.f32 %v3323_v39, %v4002_v30 }
 0x23e   :  { %1584 = vmatmul.bf16.gmra.mxu2 %v1460_v40  ;;  %v1131_v6 = vmul.f32 %v3346_v3, %v1095_v60 }
 0x23f   :  { %v1132_v40 = vmul.f32 %v3346_v3, %v1096_v61  ;;  %v4011_v61 = vld [vmem:[#allocation51_spill] sm:$0xff] }
 0x240   :  { %v1167_v62 = vadd.f32 %v3362_v56, %v1131_v6  ;;  %v4012_v6 = vld [vmem:[#allocation12_spill] sm:$0xff] }
 0x241   :  { %v1168_v49 = vadd.f32 %v3362_v56, %v1132_v40 }
 0x248   :  { %v1753_v24 = vpop.permute.xlu1 %1752  ;;  %v1763_v42 = vpop.permute.xlu2 %1762 }
 0x249   :  { %v1755_v25 = vunpack.i.h.bf16 %v1753_v24  ;;  %v1754_v4 = vunpack.i.l.bf16 %v1753_v24  ;;  %v1765_v15 = vunpack.i.h.bf16 %v1763_v42  ;;  %v1764_v20 = vunpack.i.l.bf16 %v1763_v42 }
 0x24b   :  { %v1421_v41 = vsel %vm90_vm0, %v1157_v43, %v1754_v4  ;;  %v1422_v13 = vsel %vm90_vm0, %v1158_v0, %v1755_v25  ;;  %v1439_v36 = vsel %vm90_vm0, %v1175_v54, %v1764_v20  ;;  %v1440_v10 = vsel %vm90_vm0, %v1176_v50, %v1765_v15  ;;  %v4005_v43 = vld [vmem:[#allocation48_spill] sm:$0xff]  ;;  %v4006_v54 = vld [vmem:[#allocation7_spill] sm:$0xff] }
 0x24c   :  { %v1452_v37 = vpack.c.bf16 %v1422_v13, %v1421_v41  ;;  %v1461_v51 = vpack.c.bf16 %v1440_v10, %v1439_v36  ;;  %v1087_v0 = vmul.f32 %v3283_v34, %v4005_v43  ;;  %v1088_v50 = vmul.f32 %v3316_v44, %v4006_v54  ;;  %v4007_v34 = vld [vmem:[#allocation3_spill] sm:$0xff] }
 0x24d   :  { %v1090_v44 = vmul.f32 %v3475_v38, %v4007_v34  ;;  %v4014_v43 = vld [vmem:[#allocation31_spill] sm:$0xff] }
 0x24e   :  { %1544 = vmatmul.bf16.gmra.mxu0 %v1452_v37  ;;  %1589 = vmatmul.bf16.gmra.mxu2 %v1461_v51  ;;  %v1123_v25 = vmul.f32 %v3346_v3, %v1087_v0  ;;  %v1124_v4 = vmul.f32 %v3346_v3, %v1088_v50  ;;  %v4008_v37 = vld [vmem:[#allocation24_spill] sm:$0xff]  ;;  %v1098_v0 = vmul.f32 %v3503_v48, %v4014_v43 }
 0x24f   :  { %v1089_v51 = vmul.f32 %v3480_v16, %v4008_v37 }
 0x250   :  { %v1159_v12 = vadd.f32 %v3362_v56, %v1123_v25  ;;  %v1160_v41 = vadd.f32 %v3362_v56, %v1124_v4  ;;  %v1134_v50 = vmul.f32 %v3346_v3, %v1098_v0 }
 0x251   :  { %v1758_v14 = vpop.permute.xlu0 %1757 }
 0x252   :  { %v1760_v35 = vunpack.i.h.bf16 %v1758_v14  ;;  %v1759_v19 = vunpack.i.l.bf16 %v1758_v14  ;;  %v4009_v14 = vld [vmem:[#allocation11_spill] sm:$0xff] }
 0x254   :  { %v1429_v52 = vsel %vm90_vm0, %v1165_v57, %v1759_v19  ;;  %v1430_v27 = vsel %vm90_vm0, %v1166_v58, %v1760_v35  ;;  %v1105_v35 = vmul.f32 %v3378_v1, %v4009_v14  ;;  %v4010_v19 = vld [vmem:[#allocation46_spill] sm:$0xff]  ;;  %v1125_v58 = vmul.f32 %v3346_v3, %v1089_v51 }
 0x255   :  { %v1456_v21 = vpack.c.bf16 %v1430_v27, %v1429_v52  ;;  %v1106_v57 = vmul.f32 %v3384_v32, %v4010_v19  ;;  %v1126_v52 = vmul.f32 %v3346_v3, %v1090_v44  ;;  %v1114_v1 = vmul.f32 %v3411_v23, %v4011_v61 }
 0x256   :  { %v1141_v27 = vmul.f32 %v3346_v3, %v1105_v35  ;;  %v1161_v30 = vadd.f32 %v3362_v56, %v1125_v58  ;;  %v1113_v32 = vmul.f32 %v3423_v26, %v4012_v6 }
 0x257   :  { %1564 = vmatmul.bf16.gmra.mxu1 %v1456_v21  ;;  %v1142_v5 = vmul.f32 %v3346_v3, %v1106_v57  ;;  %v1162_v16 = vadd.f32 %v3362_v56, %v1126_v52  ;;  %v1150_v26 = vmul.f32 %v3346_v3, %v1114_v1 }
 0x258   :  { %v1177_v18 = vadd.f32 %v3362_v56, %v1141_v27 }
 0x261   :  { %v1778_v55 = vpop.permute.xlu2 %1777 }
 0x262   :  { %v1780_v7 = vunpack.i.h.bf16 %v1778_v55  ;;  %v1779_v33 = vunpack.i.l.bf16 %v1778_v55 }
 0x264   :  { %v1431_v17 = vsel %vm90_vm0, %v1167_v62, %v1779_v33  ;;  %v1432_v39 = vsel %vm90_vm0, %v1168_v49, %v1780_v7  ;;  %v1178_v33 = vadd.f32 %v3362_v56, %v1142_v5  ;;  %v1149_v49 = vmul.f32 %v3346_v3, %v1113_v32 }
 0x265   :  { %v1457_v11 = vpack.c.bf16 %v1432_v39, %v1431_v17 }
 0x266   :  { %v1185_v46 = vadd.f32 %v3362_v56, %v1149_v49 }
 0x267   :  { %1569 = vmatmul.bf16.gmra.mxu1 %v1457_v11 }
 0x268   :  { %v1768_v22 = vpop.permute.xlu1 %1767 }
 0x269   :  { %v1770_v59 = vunpack.i.h.bf16 %v1768_v22  ;;  %v1769_v47 = vunpack.i.l.bf16 %v1768_v22  ;;  %v1186_v22 = vadd.f32 %v3362_v56, %v1150_v26 }
 0x26b   :  { %v1447_v31 = vsel %vm90_vm0, %v1183_v53, %v1769_v47  ;;  %v1448_v24 = vsel %vm90_vm0, %v1184_v45, %v1770_v59 }
 0x26c   :  { %v1465_v42 = vpack.c.bf16 %v1448_v24, %v1447_v31  ;;  %v4013_v24 = vld [vmem:[#allocation36_spill] sm:$0xff] }
 0x26e   :  { %1609 = vmatmul.bf16.gmra.mxu3 %v1465_v42  ;;  %v1097_v42 = vmul.f32 %v3487_v63, %v4013_v24 }
 0x270   :  { %v1133_v54 = vmul.f32 %v3346_v3, %v1097_v42  ;;  %v1170_v3 = vadd.f32 %v3362_v56, %v1134_v50 }
 0x278   :  { %v1773_v15 = vpop.permute.xlu0 %1772 }
 0x279   :  { %v1775_v20 = vunpack.i.h.bf16 %v1773_v15  ;;  %v1774_v9 = vunpack.i.l.bf16 %v1773_v15 }
 0x27b   :  { %v1423_v13 = vsel %vm90_vm0, %v1159_v12, %v1774_v9  ;;  %v1424_v36 = vsel %vm90_vm0, %v1160_v41, %v1775_v20  ;;  %v1169_v9 = vadd.f32 %v3362_v56, %v1133_v54 }
 0x27c   :  { %v1453_v10 = vpack.c.bf16 %v1424_v36, %v1423_v13 }
 0x27e   :  { %1549 = vmatmul.bf16.gmra.mxu0 %v1453_v10 }
 0x288   :  { %v1793_v21 = vpop.permute.xlu2 %1792 }
 0x289   :  { %v1795_v60 = vunpack.i.h.bf16 %v1793_v21  ;;  %v1794_v38 = vunpack.i.l.bf16 %v1793_v21 }
 0x28a   :  { %v1783_v40 = vpop.permute.xlu1 %1782 }
 0x28b   :  { %v1425_v2 = vsel %vm90_vm0, %v1161_v30, %v1794_v38  ;;  %v1426_v28 = vsel %vm90_vm0, %v1162_v16, %v1795_v60  ;;  %v1785_v29 = vunpack.i.h.bf16 %v1783_v40  ;;  %v1784_v55 = vunpack.i.l.bf16 %v1783_v40 }
 0x28c   :  { %v1454_v7 = vpack.c.bf16 %v1426_v28, %v1425_v2 }
 0x28d   :  { %v1441_v62 = vsel %vm90_vm0, %v1177_v18, %v1784_v55  ;;  %v1442_v23 = vsel %vm90_vm0, %v1178_v33, %v1785_v29 }
 0x28e   :  { %1554 = vmatmul.bf16.gmra.mxu0 %v1454_v7  ;;  %v1462_v17 = vpack.c.bf16 %v1442_v23, %v1441_v62 }
 0x290   :  { %1594 = vmatmul.bf16.gmra.mxu2 %v1462_v17  ;;  %v1788_v39 = vpop.permute.xlu0 %1787 }
 0x291   :  { %v1790_v11 = vunpack.i.h.bf16 %v1788_v39  ;;  %v1789_v8 = vunpack.i.l.bf16 %v1788_v39 }
 0x293   :  { %v1449_v59 = vsel %vm90_vm0, %v1185_v46, %v1789_v8  ;;  %v1450_v47 = vsel %vm90_vm0, %v1186_v22, %v1790_v11 }
 0x294   :  { %v1466_v53 = vpack.c.bf16 %v1450_v47, %v1449_v59 }
 0x296   :  { %1614 = vmatmul.bf16.gmra.mxu3 %v1466_v53 }
 0x29d   :  { %v1580_v45 = vpop.f32.mrf.mxu2 }
 0x29e   :  { %1636 = vst.msk [vmem:[%s3762_s7 + $0x80] sm:$0xff] %vm90_vm0, %v1580_v45 }
 0x29f   :  { %v1560_v31 = vpop.f32.mrf.mxu1 }
 0x2a0   :  { %1628 = vst.msk [vmem:[%s3762_s7 + $0x40] sm:$0xff] %vm90_vm0, %v1560_v31 }
 0x2a5   :  { %v1582_v25 = vpop.f32.mrf.mxu2 }
 0x2a6   :  { %1637 = vst.msk [vmem:[%s3762_s7 + $0x88] sm:$0xff] %vm90_vm0, %v1582_v25 }
 0x2a7   :  { %v1562_v4 = vpop.f32.mrf.mxu1 }
 0x2a8   :  { %v1798_v63 = vpop.permute.xlu1 %1797  ;;  %1629 = vst.msk [vmem:[%s3762_s7 + $0x48] sm:$0xff] %vm90_vm0, %v1562_v4  ;;  %v1600_v20 = vpop.f32.mrf.mxu3 }
 0x2a9   :  { %v1800_v48 = vunpack.i.h.bf16 %v1798_v63  ;;  %v1799_v15 = vunpack.i.l.bf16 %v1798_v63  ;;  %1644 = vst.msk [vmem:[%s3762_s7 + $0xc0] sm:$0xff] %vm90_vm0, %v1600_v20 }
 0x2ab   :  { %v1433_v12 = vsel %vm90_vm0, %v1169_v9, %v1799_v15  ;;  %v1434_v41 = vsel %vm90_vm0, %v1170_v3, %v1800_v48 }
 0x2ac   :  { %v1458_v13 = vpack.c.bf16 %v1434_v41, %v1433_v12 }
 0x2ae   :  { %1574 = vmatmul.bf16.gmra.mxu1 %v1458_v13 }
 0x2b0   :  { %v1540_v36 = vpop.f32.mrf.mxu0  ;;  %v1602_v10 = vpop.f32.mrf.mxu3 }
 0x2b1   :  { %1620 = vst.msk [vmem:[%s3762_s7] sm:$0xff] %vm90_vm0, %v1540_v36 }
 0x2b2   :  { %1645 = vst.msk [vmem:[%s3762_s7 + $0xc8] sm:$0xff] %vm90_vm0, %v1602_v10 }
 0x2b8   :  { %v1542_v56 = vpop.f32.mrf.mxu0  ;;  %v1605_v34 = vpop.f32.mrf.mxu3 }
 0x2b9   :  { %1621 = vst.msk [vmem:[%s3762_s7 + $0x8] sm:$0xff] %vm90_vm0, %v1542_v56 }
 0x2ba   :  { %1646 = vst.msk [vmem:[%s3762_s7 + $0xd0] sm:$0xff] %vm90_vm0, %v1605_v34 }
 0x2c0   :  { %v1607_v37 = vpop.f32.mrf.mxu3 }
 0x2c1   :  { %v1585_v44 = vpop.f32.mrf.mxu2  ;;  %1647 = vst.msk [vmem:[%s3762_s7 + $0xd8] sm:$0xff] %vm90_vm0, %v1607_v37 }
 0x2c2   :  { %1638 = vst.msk [vmem:[%s3762_s7 + $0x90] sm:$0xff] %vm90_vm0, %v1585_v44 }
 0x2c9   :  { %v1587_v51 = vpop.f32.mrf.mxu2 }
 0x2ca   :  { %1639 = vst.msk [vmem:[%s3762_s7 + $0x98] sm:$0xff] %vm90_vm0, %v1587_v51 }
 0x2cb   :  { %v1545_v14 = vpop.f32.mrf.mxu0 }
 0x2cc   :  { %1622 = vst.msk [vmem:[%s3762_s7 + $0x10] sm:$0xff] %vm90_vm0, %v1545_v14 }
 0x2d1   :  { %v1590_v35 = vpop.f32.mrf.mxu2 }
 0x2d2   :  { %1640 = vst.msk [vmem:[%s3762_s7 + $0xa0] sm:$0xff] %vm90_vm0, %v1590_v35 }
 0x2d3   :  { %v1547_v57 = vpop.f32.mrf.mxu0 }
 0x2d4   :  { %v1565_v19 = vpop.f32.mrf.mxu1  ;;  %1623 = vst.msk [vmem:[%s3762_s7 + $0x18] sm:$0xff] %vm90_vm0, %v1547_v57 }
 0x2d5   :  { %1630 = vst.msk [vmem:[%s3762_s7 + $0x50] sm:$0xff] %vm90_vm0, %v1565_v19 }
 0x2d9   :  { %v1592_v58 = vpop.f32.mrf.mxu2 }
 0x2da   :  { %1641 = vst.msk [vmem:[%s3762_s7 + $0xa8] sm:$0xff] %vm90_vm0, %v1592_v58 }
 0x2dc   :  { %v1567_v52 = vpop.f32.mrf.mxu1 }
 0x2dd   :  { %1631 = vst.msk [vmem:[%s3762_s7 + $0x58] sm:$0xff] %vm90_vm0, %v1567_v52 }
 0x2e4   :  { %v1570_v27 = vpop.f32.mrf.mxu1 }
 0x2e5   :  { %1632 = vst.msk [vmem:[%s3762_s7 + $0x60] sm:$0xff] %vm90_vm0, %v1570_v27 }
 0x2ec   :  { %v1572_v21 = vpop.f32.mrf.mxu1 }
 0x2ed   :  { %1633 = vst.msk [vmem:[%s3762_s7 + $0x68] sm:$0xff] %vm90_vm0, %v1572_v21 }
 0x2f1   :  { %v1610_v5 = vpop.f32.mrf.mxu3 }
 0x2f2   :  { %1648 = vst.msk [vmem:[%s3762_s7 + $0xe0] sm:$0xff] %vm90_vm0, %v1610_v5 }
 0x2f9   :  { %v1612_v60 = vpop.f32.mrf.mxu3 }
 0x2fa   :  { %1649 = vst.msk [vmem:[%s3762_s7 + $0xe8] sm:$0xff] %vm90_vm0, %v1612_v60 }
 0x2fb   :  { %v1550_v38 = vpop.f32.mrf.mxu0 }
 0x2fc   :  { %1624 = vst.msk [vmem:[%s3762_s7 + $0x20] sm:$0xff] %vm90_vm0, %v1550_v38 }
 0x303   :  { %v1552_v30 = vpop.f32.mrf.mxu0 }
 0x304   :  { %1625 = vst.msk [vmem:[%s3762_s7 + $0x28] sm:$0xff] %vm90_vm0, %v1552_v30 }
 0x30b   :  { %v1555_v16 = vpop.f32.mrf.mxu0 }
 0x30c   :  { %1626 = vst.msk [vmem:[%s3762_s7 + $0x30] sm:$0xff] %vm90_vm0, %v1555_v16 }
 0x313   :  { %v1557_v61 = vpop.f32.mrf.mxu0  ;;  %v1595_v1 = vpop.f32.mrf.mxu2 }
 0x314   :  { %1627 = vst.msk [vmem:[%s3762_s7 + $0x38] sm:$0xff] %vm90_vm0, %v1557_v61 }
 0x315   :  { %1642 = vst.msk [vmem:[%s3762_s7 + $0xb0] sm:$0xff] %vm90_vm0, %v1595_v1 }
 0x319   :  { %v1615_v6 = vpop.f32.mrf.mxu3 }
 0x31a   :  { %1650 = vst.msk [vmem:[%s3762_s7 + $0xf0] sm:$0xff] %vm90_vm0, %v1615_v6 }
 0x31b   :  { %v1597_v32 = vpop.f32.mrf.mxu2 }
 0x31c   :  { %1643 = vst.msk [vmem:[%s3762_s7 + $0xb8] sm:$0xff] %vm90_vm0, %v1597_v32 }
 0x321   :  { %v1617_v40 = vpop.f32.mrf.mxu3 }
 0x322   :  { %1651 = vst.msk [vmem:[%s3762_s7 + $0xf8] sm:$0xff] %vm90_vm0, %v1617_v40 }
 0x32b   :  { %v1575_v2 = vpop.f32.mrf.mxu1 }
 0x32c   :  { %1634 = vst.msk [vmem:[%s3762_s7 + $0x70] sm:$0xff] %vm90_vm0, %v1575_v2 }
 0x333   :  { %v1577_v28 = vpop.f32.mrf.mxu1 }
 0x334   :  { %1635 = vst.msk [vmem:[%s3762_s7 + $0x78] sm:$0xff] %vm90_vm0, %v1577_v28 }

</bundles_post_ra>
